<compile_context>
chip_gen: v7x
topology: tpu7x:2x2x1
jax: 0.10.0
libtpu: 0.0.40
codegen_flags: <defaults>
</compile_context>

<pallas_src>
import jax
import jax.numpy as jnp
from jax import lax
from jax.experimental import pallas as pl
from jax.experimental.pallas import tpu as pltpu


def _round_up(x, m):
    return ((x + m - 1) // m) * m


# ----------------------------- Pallas kernel -------------------------------
def _worker_kernel(x_ref, g_ref, h0_ref, c0_ref,
                   w1_ref, b1_ref,
                   wih_ref, blp_ref, whh_ref,
                   wu_ref, bu_ref,
                   wwrep_ref, bwrep_ref, sel_ref,
                   q_ref, hout_ref, cout_ref,
                   gx_sc, hh_sc):
    T, TN, F = x_ref.shape            # timesteps, rows in this tile, features
    HP = h0_ref.shape[1]              # hidden dim padded to a multiple of 128
    D = g_ref.shape[2]
    nA = q_ref.shape[2]
    rows = T * TN

    # ---- batched prologue (MXU): fc1 + ReLU, then input-side LSTM gates ----
    x2 = x_ref[...].reshape(rows, F)
    a = jnp.maximum(
        jnp.dot(x2, w1_ref[...], preferred_element_type=jnp.float32)
        + b1_ref[...], 0.0)
    # gates_x = a @ W_ih + (b_ih + b_hh), gate g in aligned lanes [g*HP, g*HP+H)
    gx_sc[...] = (jnp.dot(a, wih_ref[...], preferred_element_type=jnp.float32)
                  + blp_ref[...])

    # ---- sequential LSTM recurrence: one matmul + elementwise per step ----
    whh = whh_ref[...]                # hoisted out of the loop

    def step(t, carry):
        h, c = carry
        row = pl.multiple_of(t * TN, TN)
        gates = (gx_sc[pl.ds(row, TN), :]
                 + jnp.dot(h, whh, preferred_element_type=jnp.float32))
        # torch.nn.LSTM gate order: i, f, g, o -- each a full aligned 128-lane block
        i_g = jax.nn.sigmoid(gates[:, 0 * HP:1 * HP])
        f_g = jax.nn.sigmoid(gates[:, 1 * HP:2 * HP])
        g_g = jnp.tanh(gates[:, 2 * HP:3 * HP])
        o_g = jax.nn.sigmoid(gates[:, 3 * HP:4 * HP])
        c_new = f_g * c + i_g * g_g
        h_new = o_g * jnp.tanh(c_new)
        hh_sc[pl.ds(row, TN), :] = h_new          # h-history for the epilogue
        return h_new, c_new

    h_T, c_T = lax.fori_loop(0, T, step, (h0_ref[...], c0_ref[...]),
                             unroll=(T if T <= 8 else 8))
    hout_ref[...] = h_T
    cout_ref[...] = c_T

    # ---- batched epilogue over all T*TN rows (MXU) ----
    hh = hh_sc[...]
    U = jnp.dot(hh, wu_ref[...], preferred_element_type=jnp.float32) + bu_ref[...]
    g2 = g_ref[...].reshape(rows, D)
    # tile matrix folded into the goal projection: w_rep[n, a*K+k] = wv[n, k]
    w_rep = (jnp.dot(g2, wwrep_ref[...], preferred_element_type=jnp.float32)
             + bwrep_ref[...])
    # block-sum selector reduces over k on the MXU (padded rows/cols are zero)
    q = jnp.dot(U * w_rep, sel_ref[...], preferred_element_type=jnp.float32)
    q_ref[...] = q.reshape(T, TN, nA).astype(q_ref.dtype)


# ------------------------------ wrapper -------------------------------------
def feudal_worker_forward(inputs, worker_hidden, goal, params, *,
                          worker_hidden_dim, embedding_dim_k, n_actions,
                          state_dim_d):
    """inputs: (T, B, A, feat) f32; goal: (T, B, A, state_dim_d) f32;
       worker_hidden: (h, c) each (1, B*A, worker_hidden_dim) f32."""
    T, B, A, F = inputs.shape
    N = B * A
    H, K, nA, D = worker_hidden_dim, embedding_dim_k, n_actions, state_dim_d
    HP = _round_up(H, 128)            # lane-aligned hidden dim
    AK = nA * K
    AKP = _round_up(AK, 128)

    # TODO(synk): smarter TILE_N choice for 256 < N with low padding waste.
    TILE_N = min(_round_up(N, 8), 256)
    N_pad = _round_up(N, TILE_N)
    n_tiles = N_pad // TILE_N

    f32 = jnp.float32
    x = inputs.reshape(T, N, F).astype(f32)
    g = goal.reshape(T, N, D).astype(f32)
    h0 = worker_hidden[0].reshape(N, H).astype(f32)
    c0 = worker_hidden[1].reshape(N, H).astype(f32)

    if N_pad != N:
        pad = N_pad - N
        x = jnp.pad(x, ((0, 0), (0, pad), (0, 0)))
        g = jnp.pad(g, ((0, 0), (0, pad), (0, 0)))
        h0 = jnp.pad(h0, ((0, pad), (0, 0)))
        c0 = jnp.pad(c0, ((0, pad), (0, 0)))
    h0 = jnp.pad(h0, ((0, 0), (0, HP - H)))
    c0 = jnp.pad(c0, ((0, 0), (0, HP - H)))

    # Gate-aligned LSTM weight layout: gate g lives in lanes [g*HP, g*HP+H).
    def gate_pad_cols(w, rows_out):
        out = jnp.zeros((rows_out, 4 * HP), f32)
        src = w.astype(f32)
        for gidx in range(4):
            out = out.at[:src.shape[0], gidx * HP:gidx * HP + H].set(
                src[:, gidx * H:(gidx + 1) * H])
        return out

    wih_p = gate_pad_cols(params["wih"], H)       # (H, 4*HP)
    whh_p = gate_pad_cols(params["whh"], HP)      # (HP, 4*HP), rows >= H are zero
    blp = gate_pad_cols(params["bl"], 1)          # (1, 4*HP)

    wu_p = jnp.zeros((HP, AKP), f32).at[:H, :AK].set(params["wu"].astype(f32))
    bu_p = jnp.zeros((1, AKP), f32).at[:, :AK].set(params["bu"].astype(f32))

    # Fold the "replicate wv across n_actions" tile matrix into the goal proj.
    tile = jnp.tile(jnp.eye(K, dtype=f32), (1, nA))                     # (K, AK)
    wwrep = jnp.zeros((D, AKP), f32).at[:, :AK].set(params["ww"].astype(f32) @ tile)
    bwrep = jnp.zeros((1, AKP), f32).at[:, :AK].set(params["bw"].astype(f32) @ tile)

    # Block-sum selector: row a*K + k -> column a (padded rows are zero).
    sel = jnp.zeros((AKP, nA), f32).at[:AK, :].set(
        jnp.repeat(jnp.eye(nA, dtype=f32), K, axis=0))

    w1 = params["w1"].astype(f32)
    b1 = params["b1"].astype(f32)

    weights = (w1, b1, wih_p, blp, whh_p, wu_p, bu_p, wwrep, bwrep, sel)

    def full_spec(arr):
        nd = arr.ndim
        return pl.BlockSpec(arr.shape, lambda i, _nd=nd: (0,) * _nd)

    in_specs = [
        pl.BlockSpec((T, TILE_N, F), lambda i: (0, i, 0)),
        pl.BlockSpec((T, TILE_N, D), lambda i: (0, i, 0)),
        pl.BlockSpec((TILE_N, HP), lambda i: (i, 0)),
        pl.BlockSpec((TILE_N, HP), lambda i: (i, 0)),
    ] + [full_spec(w) for w in weights]

    out_specs = (
        pl.BlockSpec((T, TILE_N, nA), lambda i: (0, i, 0)),
        pl.BlockSpec((TILE_N, HP), lambda i: (i, 0)),
        pl.BlockSpec((TILE_N, HP), lambda i: (i, 0)),
    )
    out_shape = (
        jax.ShapeDtypeStruct((T, N_pad, nA), f32),
        jax.ShapeDtypeStruct((N_pad, HP), f32),
        jax.ShapeDtypeStruct((N_pad, HP), f32),
    )
    scratch_shapes = [
        pltpu.VMEM((T * TILE_N, 4 * HP), f32),   # hoisted input-side gates
        pltpu.VMEM((T * TILE_N, HP), f32),       # LSTM hidden history
    ]

    # Explicit VMEM budget: blocked ins/outs double-buffered + weights + scratch.
    def nbytes(*shapes):
        tot = 0
        for s in shapes:
            n = 1
            for d in s:
                n *= int(d)
            tot += 4 * n
        return tot

    est = (2 * nbytes((T, TILE_N, F), (T, TILE_N, D), (TILE_N, HP), (TILE_N, HP),
                      (T, TILE_N, nA), (TILE_N, HP), (TILE_N, HP))
           + 2 * nbytes(*(w.shape for w in weights))
           + nbytes((T * TILE_N, 4 * HP), (T * TILE_N, HP))
           + (8 << 20))
    vmem_limit = int(min(max(est, 32 << 20), 64 << 20))

    q_pad, h_T, c_T = pl.pallas_call(
        _worker_kernel,
        out_shape=out_shape,
        grid_spec=pltpu.PrefetchScalarGridSpec(
            num_scalar_prefetch=0,
            grid=(n_tiles,),
            in_specs=in_specs,
            out_specs=out_specs,
            scratch_shapes=scratch_shapes),
        compiler_params=pltpu.CompilerParams(
            dimension_semantics=("parallel",),
            vmem_limit_bytes=vmem_limit),
    )(x, g, h0, c0, *weights)

    q = q_pad[:, :N, :].reshape(T, B, A, nA)
    h_out = h_T[:N, :H].reshape(1, N, H)
    c_out = c_T[:N, :H].reshape(1, N, H)
    return q, (h_out, c_out)


# ------------------------- pure-JAX reference --------------------------------
def feudal_worker_reference(inputs, worker_hidden, goal, params, *,
                            worker_hidden_dim, embedding_dim_k, n_actions,
                            state_dim_d):
    T, B, A, F = inputs.shape
    N = B * A
    H = worker_hidden_dim
    K = embedding_dim_k
    x = inputs.reshape(T, N, F)
    g = goal.reshape(T, N, state_dim_d)
    a = jnp.maximum(x @ params["w1"] + params["b1"], 0.0)

    def cell(carry, a_t):
        h, c = carry
        gates = a_t @ params["wih"] + h @ params["whh"] + params["bl"]
        i = jax.nn.sigmoid(gates[:, 0 * H:1 * H])
        f = jax.nn.sigmoid(gates[:, 1 * H:2 * H])
        gg = jnp.tanh(gates[:, 2 * H:3 * H])
        o = jax.nn.sigmoid(gates[:, 3 * H:4 * H])
        c_new = f * c + i * gg
        h_new = o * jnp.tanh(c_new)
        return (h_new, c_new), h_new

    h0 = worker_hidden[0].reshape(N, H)
    c0 = worker_hidden[1].reshape(N, H)
    (h_T, c_T), out = lax.scan(cell, (h0, c0), a)

    U = out @ params["wu"] + params["bu"]                    # (T, N, nA*K)
    U3 = U.reshape(T * N, n_actions, K)
    wv = (g @ params["ww"] + params["bw"]).reshape(T * N, K)
    q = jnp.einsum("nak,nk->na", U3, wv).reshape(T, B, A, n_actions)
    return q, (h_T.reshape(1, N, H), c_T.reshape(1, N, H))


# ------------------------------- main ----------------------------------------
if __name__ == "__main__":
    # small args
    T, B, A = 4, 2, 3
    input_shape = 16          # feat
    worker_hidden_dim = 32
    embedding_dim_k = 8
    n_actions = 6
    state_dim_d = 12
    N = B * A

    key = jax.random.PRNGKey(0)
    ks = jax.random.split(key, 16)

    def rnd(k, shape, scale=0.1):
        return scale * jax.random.normal(k, shape, dtype=jnp.float32)

    H, K, nA, F, D = worker_hidden_dim, embedding_dim_k, n_actions, input_shape, state_dim_d
    params = {
        "w1":  rnd(ks[0], (F, H)),            "b1":  rnd(ks[1], (1, H)),
        "wih": rnd(ks[2], (H, 4 * H)),        "whh": rnd(ks[3], (H, 4 * H)),
        "bl":  rnd(ks[4], (1, 4 * H)),        # = bias_ih + bias_hh, pre-summed
        "wu":  rnd(ks[5], (H, nA * K)),       "bu":  rnd(ks[6], (1, nA * K)),
        "ww":  rnd(ks[7], (D, K)),            "bw":  rnd(ks[8], (1, K)),
    }

    inputs = jax.random.normal(ks[9], (T, B, A, F), dtype=jnp.float32)
    goal = jax.random.normal(ks[10], (T, B, A, D), dtype=jnp.float32)
    h0 = jnp.zeros((1, N, H), jnp.float32)
    c0 = jnp.zeros((1, N, H), jnp.float32)

    kw = dict(worker_hidden_dim=H, embedding_dim_k=K,
              n_actions=nA, state_dim_d=D)

    q, (h, c) = feudal_worker_forward(inputs, (h0, c0), goal, params, **kw)
    jax.block_until_ready((q, h, c))

    q_ref, (h_ref, c_ref) = feudal_worker_reference(
        inputs, (h0, c0), goal, params, **kw)

    assert q.shape == (T, B, A, nA)
    assert h.shape == (1, N, H) and c.shape == (1, N, H)
    assert jnp.allclose(q, q_ref, atol=1e-5, rtol=1e-5)
    assert jnp.allclose(h, h_ref, atol=1e-5, rtol=1e-5)
    assert jnp.allclose(c, c_ref, atol=1e-5, rtol=1e-5)

    print("KERNEL_OK")
</pallas_src>

<mosaic_0001>
module attributes {stable_mosaic.version = 11 : i64} {
  func.func @_worker_kernel(%arg0: i32, %arg1: memref<4x8x16xf32, #tpu.memory_space<vmem>>, %arg2: memref<4x8x12xf32, #tpu.memory_space<vmem>>, %arg3: memref<8x128xf32, #tpu.memory_space<vmem>>, %arg4: memref<8x128xf32, #tpu.memory_space<vmem>>, %arg5: memref<16x32xf32, #tpu.memory_space<vmem>>, %arg6: memref<1x32xf32, #tpu.memory_space<vmem>>, %arg7: memref<32x512xf32, #tpu.memory_space<vmem>>, %arg8: memref<1x512xf32, #tpu.memory_space<vmem>>, %arg9: memref<128x512xf32, #tpu.memory_space<vmem>>, %arg10: memref<128x128xf32, #tpu.memory_space<vmem>>, %arg11: memref<1x128xf32, #tpu.memory_space<vmem>>, %arg12: memref<12x128xf32, #tpu.memory_space<vmem>>, %arg13: memref<1x128xf32, #tpu.memory_space<vmem>>, %arg14: memref<128x6xf32, #tpu.memory_space<vmem>>, %arg15: memref<4x8x6xf32, #tpu.memory_space<vmem>>, %arg16: memref<8x128xf32, #tpu.memory_space<vmem>>, %arg17: memref<8x128xf32, #tpu.memory_space<vmem>>, %arg18: memref<32x512xf32, #tpu.memory_space<vmem>>, %arg19: memref<32x128xf32, #tpu.memory_space<vmem>>) attributes {dimension_semantics = [#tpu.dimension_semantics<parallel>], iteration_bounds = array<i64: 1>, scalar_prefetch = 0 : i64, scratch_operands = 2 : i64, tpu.core_type = #tpu.core_type<tc>, window_params = [{transform_indices = @transform_0, window_bounds = array<i64: 4, 8, 16>}, {transform_indices = @transform_1, window_bounds = array<i64: 4, 8, 12>}, {transform_indices = @transform_2, window_bounds = array<i64: 8, 128>}, {transform_indices = @transform_3, window_bounds = array<i64: 8, 128>}, {pipeline_mode = #tpu.pipeline_mode<synchronous>, transform_indices = @transform_4, window_bounds = array<i64: 16, 32>}, {pipeline_mode = #tpu.pipeline_mode<synchronous>, transform_indices = @transform_5, window_bounds = array<i64: 1, 32>}, {pipeline_mode = #tpu.pipeline_mode<synchronous>, transform_indices = @transform_6, window_bounds = array<i64: 32, 512>}, {pipeline_mode = #tpu.pipeline_mode<synchronous>, transform_indices = @transform_7, window_bounds = array<i64: 1, 512>}, {pipeline_mode = #tpu.pipeline_mode<synchronous>, transform_indices = @transform_8, window_bounds = array<i64: 128, 512>}, {pipeline_mode = #tpu.pipeline_mode<synchronous>, transform_indices = @transform_9, window_bounds = array<i64: 128, 128>}, {pipeline_mode = #tpu.pipeline_mode<synchronous>, transform_indices = @transform_10, window_bounds = array<i64: 1, 128>}, {pipeline_mode = #tpu.pipeline_mode<synchronous>, transform_indices = @transform_11, window_bounds = array<i64: 12, 128>}, {pipeline_mode = #tpu.pipeline_mode<synchronous>, transform_indices = @transform_12, window_bounds = array<i64: 1, 128>}, {pipeline_mode = #tpu.pipeline_mode<synchronous>, transform_indices = @transform_13, window_bounds = array<i64: 128, 6>}, {transform_indices = @transform_14, window_bounds = array<i64: 4, 8, 6>}, {transform_indices = @transform_15, window_bounds = array<i64: 8, 128>}, {transform_indices = @transform_16, window_bounds = array<i64: 8, 128>}]} {
    %c0 = arith.constant 0 : index
    %c0_0 = arith.constant 0 : index
    %c0_1 = arith.constant 0 : index
    %0 = vector.load %arg1[%c0, %c0_0, %c0_1] : memref<4x8x16xf32, #tpu.memory_space<vmem>>, vector<4x8x16xf32>
    %1 = vector.shape_cast %0 : vector<4x8x16xf32> to vector<32x16xf32>
    %c0_2 = arith.constant 0 : index
    %c0_3 = arith.constant 0 : index
    %2 = vector.load %arg5[%c0_2, %c0_3] : memref<16x32xf32, #tpu.memory_space<vmem>>, vector<16x32xf32>
    %cst = arith.constant dense<0.000000e+00> : vector<32x32xf32>
    %3 = tpu.matmul %1, %2, %cst {dimension_numbers = #tpu.dot_dimension_numbers<[1], [0], [0], [1], [0, 0, 1, 1], [], []>} : vector<32x16xf32>, vector<16x32xf32>, vector<32x32xf32> -> vector<32x32xf32>
    %c0_4 = arith.constant 0 : index
    %c0_5 = arith.constant 0 : index
    %4 = vector.load %arg6[%c0_4, %c0_5] : memref<1x32xf32, #tpu.memory_space<vmem>>, vector<1x32xf32>
    %5 = vector.broadcast %4 : vector<1x32xf32> to vector<32x32xf32>
    %6 = arith.addf %3, %5 : vector<32x32xf32>
    %cst_6 = arith.constant 0.000000e+00 : f32
    %7 = vector.broadcast %cst_6 : f32 to vector<32x32xf32>
    %8 = arith.maximumf %6, %7 : vector<32x32xf32>
    %c0_7 = arith.constant 0 : index
    %c0_8 = arith.constant 0 : index
    %9 = vector.load %arg7[%c0_7, %c0_8] : memref<32x512xf32, #tpu.memory_space<vmem>>, vector<32x512xf32>
    %cst_9 = arith.constant dense<0.000000e+00> : vector<32x512xf32>
    %10 = tpu.matmul %8, %9, %cst_9 {dimension_numbers = #tpu.dot_dimension_numbers<[1], [0], [0], [1], [0, 0, 1, 1], [], []>} : vector<32x32xf32>, vector<32x512xf32>, vector<32x512xf32> -> vector<32x512xf32>
    %c0_10 = arith.constant 0 : index
    %c0_11 = arith.constant 0 : index
    %11 = vector.load %arg8[%c0_10, %c0_11] : memref<1x512xf32, #tpu.memory_space<vmem>>, vector<1x512xf32>
    %12 = vector.broadcast %11 : vector<1x512xf32> to vector<32x512xf32>
    %13 = arith.addf %10, %12 : vector<32x512xf32>
    %c0_12 = arith.constant 0 : index
    %c0_13 = arith.constant 0 : index
    %14 = vector.load %arg18[%c0_12, %c0_13] : memref<32x512xf32, #tpu.memory_space<vmem>>, vector<32x512xf32>
    tpu.vector_store %arg18[%c0_12, %c0_13], %13 {strides = array<i32>} : memref<32x512xf32, #tpu.memory_space<vmem>>, vector<32x512xf32>,
    %c0_14 = arith.constant 0 : index
    %c0_15 = arith.constant 0 : index
    %15 = vector.load %arg9[%c0_14, %c0_15] : memref<128x512xf32, #tpu.memory_space<vmem>>, vector<128x512xf32>
    %c0_16 = arith.constant 0 : index
    %c0_17 = arith.constant 0 : index
    %16 = vector.load %arg3[%c0_16, %c0_17] : memref<8x128xf32, #tpu.memory_space<vmem>>, vector<8x128xf32>
    %c0_18 = arith.constant 0 : index
    %c0_19 = arith.constant 0 : index
    %17 = vector.load %arg4[%c0_18, %c0_19] : memref<8x128xf32, #tpu.memory_space<vmem>>, vector<8x128xf32>
    %c0_i32 = arith.constant 0 : i32
    %c8_i32 = arith.constant 8 : i32
    %18 = arith.muli %c0_i32, %c8_i32 : i32
    %19 = tpu.assume_multiple %18, 8 : i32
    %20 = arith.index_cast %19 : i32 to index
    %c0_20 = arith.constant 0 : index
    %21 = vector.load %arg18[%20, %c0_20] : memref<32x512xf32, #tpu.memory_space<vmem>>, vector<8x512xf32>
    %cst_21 = arith.constant dense<0.000000e+00> : vector<8x512xf32>
    %22 = tpu.matmul %16, %15, %cst_21 {dimension_numbers = #tpu.dot_dimension_numbers<[1], [0], [0], [1], [0, 0, 1, 1], [], []>} : vector<8x128xf32>, vector<128x512xf32>, vector<8x512xf32> -> vector<8x512xf32>
    %23 = arith.addf %21, %22 : vector<8x512xf32>
    %24 = vector.extract_strided_slice %23 {offsets = [0, 0], sizes = [8, 128], strides = [1, 1]} : vector<8x512xf32> to vector<8x128xf32>
    %25 = arith.negf %24 : vector<8x128xf32>
    %26 = math.exp %25 : vector<8x128xf32>
    %cst_22 = arith.constant 1.000000e+00 : f32
    %27 = vector.broadcast %cst_22 : f32 to vector<8x128xf32>
    %28 = arith.addf %27, %26 : vector<8x128xf32>
    %29 = arith.divf %27, %28 : vector<8x128xf32>
    %30 = vector.extract_strided_slice %23 {offsets = [0, 128], sizes = [8, 128], strides = [1, 1]} : vector<8x512xf32> to vector<8x128xf32>
    %31 = arith.negf %30 : vector<8x128xf32>
    %32 = math.exp %31 : vector<8x128xf32>
    %cst_23 = arith.constant 1.000000e+00 : f32
    %33 = vector.broadcast %cst_23 : f32 to vector<8x128xf32>
    %34 = arith.addf %33, %32 : vector<8x128xf32>
    %35 = arith.divf %33, %34 : vector<8x128xf32>
    %36 = vector.extract_strided_slice %23 {offsets = [0, 256], sizes = [8, 128], strides = [1, 1]} : vector<8x512xf32> to vector<8x128xf32>
    %37 = math.tanh %36 : vector<8x128xf32>
    %38 = vector.extract_strided_slice %23 {offsets = [0, 384], sizes = [8, 128], strides = [1, 1]} : vector<8x512xf32> to vector<8x128xf32>
    %39 = arith.negf %38 : vector<8x128xf32>
    %40 = math.exp %39 : vector<8x128xf32>
    %cst_24 = arith.constant 1.000000e+00 : f32
    %41 = vector.broadcast %cst_24 : f32 to vector<8x128xf32>
    %42 = arith.addf %41, %40 : vector<8x128xf32>
    %43 = arith.divf %41, %42 : vector<8x128xf32>
    %44 = arith.mulf %35, %17 : vector<8x128xf32>
    %45 = arith.mulf %29, %37 : vector<8x128xf32>
    %46 = arith.addf %44, %45 : vector<8x128xf32>
    %47 = math.tanh %46 : vector<8x128xf32>
    %48 = arith.mulf %43, %47 : vector<8x128xf32>
    %49 = arith.index_cast %19 : i32 to index
    %c0_25 = arith.constant 0 : index
    %50 = vector.load %arg19[%49, %c0_25] : memref<32x128xf32, #tpu.memory_space<vmem>>, vector<8x128xf32>
    tpu.vector_store %arg19[%49, %c0_25], %48 {strides = array<i32>} : memref<32x128xf32, #tpu.memory_space<vmem>>, vector<8x128xf32>,
    %c1_i32 = arith.constant 1 : i32
    %c8_i32_26 = arith.constant 8 : i32
    %51 = arith.muli %c1_i32, %c8_i32_26 : i32
    %52 = tpu.assume_multiple %51, 8 : i32
    %53 = arith.index_cast %52 : i32 to index
    %c0_27 = arith.constant 0 : index
    %54 = vector.load %arg18[%53, %c0_27] : memref<32x512xf32, #tpu.memory_space<vmem>>, vector<8x512xf32>
    %cst_28 = arith.constant dense<0.000000e+00> : vector<8x512xf32>
    %55 = tpu.matmul %48, %15, %cst_28 {dimension_numbers = #tpu.dot_dimension_numbers<[1], [0], [0], [1], [0, 0, 1, 1], [], []>} : vector<8x128xf32>, vector<128x512xf32>, vector<8x512xf32> -> vector<8x512xf32>
    %56 = arith.addf %54, %55 : vector<8x512xf32>
    %57 = vector.extract_strided_slice %56 {offsets = [0, 0], sizes = [8, 128], strides = [1, 1]} : vector<8x512xf32> to vector<8x128xf32>
    %58 = arith.negf %57 : vector<8x128xf32>
    %59 = math.exp %58 : vector<8x128xf32>
    %cst_29 = arith.constant 1.000000e+00 : f32
    %60 = vector.broadcast %cst_29 : f32 to vector<8x128xf32>
    %61 = arith.addf %60, %59 : vector<8x128xf32>
    %62 = arith.divf %60, %61 : vector<8x128xf32>
    %63 = vector.extract_strided_slice %56 {offsets = [0, 128], sizes = [8, 128], strides = [1, 1]} : vector<8x512xf32> to vector<8x128xf32>
    %64 = arith.negf %63 : vector<8x128xf32>
    %65 = math.exp %64 : vector<8x128xf32>
    %cst_30 = arith.constant 1.000000e+00 : f32
    %66 = vector.broadcast %cst_30 : f32 to vector<8x128xf32>
    %67 = arith.addf %66, %65 : vector<8x128xf32>
    %68 = arith.divf %66, %67 : vector<8x128xf32>
    %69 = vector.extract_strided_slice %56 {offsets = [0, 256], sizes = [8, 128], strides = [1, 1]} : vector<8x512xf32> to vector<8x128xf32>
    %70 = math.tanh %69 : vector<8x128xf32>
    %71 = vector.extract_strided_slice %56 {offsets = [0, 384], sizes = [8, 128], strides = [1, 1]} : vector<8x512xf32> to vector<8x128xf32>
    %72 = arith.negf %71 : vector<8x128xf32>
    %73 = math.exp %72 : vector<8x128xf32>
    %cst_31 = arith.constant 1.000000e+00 : f32
    %74 = vector.broadcast %cst_31 : f32 to vector<8x128xf32>
    %75 = arith.addf %74, %73 : vector<8x128xf32>
    %76 = arith.divf %74, %75 : vector<8x128xf32>
    %77 = arith.mulf %68, %46 : vector<8x128xf32>
    %78 = arith.mulf %62, %70 : vector<8x128xf32>
    %79 = arith.addf %77, %78 : vector<8x128xf32>
    %80 = math.tanh %79 : vector<8x128xf32>
    %81 = arith.mulf %76, %80 : vector<8x128xf32>
    %82 = arith.index_cast %52 : i32 to index
    %c0_32 = arith.constant 0 : index
    %83 = vector.load %arg19[%82, %c0_32] : memref<32x128xf32, #tpu.memory_space<vmem>>, vector<8x128xf32>
    tpu.vector_store %arg19[%82, %c0_32], %81 {strides = array<i32>} : memref<32x128xf32, #tpu.memory_space<vmem>>, vector<8x128xf32>,
    %c2_i32 = arith.constant 2 : i32
    %c8_i32_33 = arith.constant 8 : i32
    %84 = arith.muli %c2_i32, %c8_i32_33 : i32
    %85 = tpu.assume_multiple %84, 8 : i32
    %86 = arith.index_cast %85 : i32 to index
    %c0_34 = arith.constant 0 : index
    %87 = vector.load %arg18[%86, %c0_34] : memref<32x512xf32, #tpu.memory_space<vmem>>, vector<8x512xf32>
    %cst_35 = arith.constant dense<0.000000e+00> : vector<8x512xf32>
    %88 = tpu.matmul %81, %15, %cst_35 {dimension_numbers = #tpu.dot_dimension_numbers<[1], [0], [0], [1], [0, 0, 1, 1], [], []>} : vector<8x128xf32>, vector<128x512xf32>, vector<8x512xf32> -> vector<8x512xf32>
    %89 = arith.addf %87, %88 : vector<8x512xf32>
    %90 = vector.extract_strided_slice %89 {offsets = [0, 0], sizes = [8, 128], strides = [1, 1]} : vector<8x512xf32> to vector<8x128xf32>
    %91 = arith.negf %90 : vector<8x128xf32>
    %92 = math.exp %91 : vector<8x128xf32>
    %cst_36 = arith.constant 1.000000e+00 : f32
    %93 = vector.broadcast %cst_36 : f32 to vector<8x128xf32>
    %94 = arith.addf %93, %92 : vector<8x128xf32>
    %95 = arith.divf %93, %94 : vector<8x128xf32>
    %96 = vector.extract_strided_slice %89 {offsets = [0, 128], sizes = [8, 128], strides = [1, 1]} : vector<8x512xf32> to vector<8x128xf32>
    %97 = arith.negf %96 : vector<8x128xf32>
    %98 = math.exp %97 : vector<8x128xf32>
    %cst_37 = arith.constant 1.000000e+00 : f32
    %99 = vector.broadcast %cst_37 : f32 to vector<8x128xf32>
    %100 = arith.addf %99, %98 : vector<8x128xf32>
    %101 = arith.divf %99, %100 : vector<8x128xf32>
    %102 = vector.extract_strided_slice %89 {offsets = [0, 256], sizes = [8, 128], strides = [1, 1]} : vector<8x512xf32> to vector<8x128xf32>
    %103 = math.tanh %102 : vector<8x128xf32>
    %104 = vector.extract_strided_slice %89 {offsets = [0, 384], sizes = [8, 128], strides = [1, 1]} : vector<8x512xf32> to vector<8x128xf32>
    %105 = arith.negf %104 : vector<8x128xf32>
    %106 = math.exp %105 : vector<8x128xf32>
    %cst_38 = arith.constant 1.000000e+00 : f32
    %107 = vector.broadcast %cst_38 : f32 to vector<8x128xf32>
    %108 = arith.addf %107, %106 : vector<8x128xf32>
    %109 = arith.divf %107, %108 : vector<8x128xf32>
    %110 = arith.mulf %101, %79 : vector<8x128xf32>
    %111 = arith.mulf %95, %103 : vector<8x128xf32>
    %112 = arith.addf %110, %111 : vector<8x128xf32>
    %113 = math.tanh %112 : vector<8x128xf32>
    %114 = arith.mulf %109, %113 : vector<8x128xf32>
    %115 = arith.index_cast %85 : i32 to index
    %c0_39 = arith.constant 0 : index
    %116 = vector.load %arg19[%115, %c0_39] : memref<32x128xf32, #tpu.memory_space<vmem>>, vector<8x128xf32>
    tpu.vector_store %arg19[%115, %c0_39], %114 {strides = array<i32>} : memref<32x128xf32, #tpu.memory_space<vmem>>, vector<8x128xf32>,
    %c3_i32 = arith.constant 3 : i32
    %c8_i32_40 = arith.constant 8 : i32
    %117 = arith.muli %c3_i32, %c8_i32_40 : i32
    %118 = tpu.assume_multiple %117, 8 : i32
    %119 = arith.index_cast %118 : i32 to index
    %c0_41 = arith.constant 0 : index
    %120 = vector.load %arg18[%119, %c0_41] : memref<32x512xf32, #tpu.memory_space<vmem>>, vector<8x512xf32>
    %cst_42 = arith.constant dense<0.000000e+00> : vector<8x512xf32>
    %121 = tpu.matmul %114, %15, %cst_42 {dimension_numbers = #tpu.dot_dimension_numbers<[1], [0], [0], [1], [0, 0, 1, 1], [], []>} : vector<8x128xf32>, vector<128x512xf32>, vector<8x512xf32> -> vector<8x512xf32>
    %122 = arith.addf %120, %121 : vector<8x512xf32>
    %123 = vector.extract_strided_slice %122 {offsets = [0, 0], sizes = [8, 128], strides = [1, 1]} : vector<8x512xf32> to vector<8x128xf32>
    %124 = arith.negf %123 : vector<8x128xf32>
    %125 = math.exp %124 : vector<8x128xf32>
    %cst_43 = arith.constant 1.000000e+00 : f32
    %126 = vector.broadcast %cst_43 : f32 to vector<8x128xf32>
    %127 = arith.addf %126, %125 : vector<8x128xf32>
    %128 = arith.divf %126, %127 : vector<8x128xf32>
    %129 = vector.extract_strided_slice %122 {offsets = [0, 128], sizes = [8, 128], strides = [1, 1]} : vector<8x512xf32> to vector<8x128xf32>
    %130 = arith.negf %129 : vector<8x128xf32>
    %131 = math.exp %130 : vector<8x128xf32>
    %cst_44 = arith.constant 1.000000e+00 : f32
    %132 = vector.broadcast %cst_44 : f32 to vector<8x128xf32>
    %133 = arith.addf %132, %131 : vector<8x128xf32>
    %134 = arith.divf %132, %133 : vector<8x128xf32>
    %135 = vector.extract_strided_slice %122 {offsets = [0, 256], sizes = [8, 128], strides = [1, 1]} : vector<8x512xf32> to vector<8x128xf32>
    %136 = math.tanh %135 : vector<8x128xf32>
    %137 = vector.extract_strided_slice %122 {offsets = [0, 384], sizes = [8, 128], strides = [1, 1]} : vector<8x512xf32> to vector<8x128xf32>
    %138 = arith.negf %137 : vector<8x128xf32>
    %139 = math.exp %138 : vector<8x128xf32>
    %cst_45 = arith.constant 1.000000e+00 : f32
    %140 = vector.broadcast %cst_45 : f32 to vector<8x128xf32>
    %141 = arith.addf %140, %139 : vector<8x128xf32>
    %142 = arith.divf %140, %141 : vector<8x128xf32>
    %143 = arith.mulf %134, %112 : vector<8x128xf32>
    %144 = arith.mulf %128, %136 : vector<8x128xf32>
    %145 = arith.addf %143, %144 : vector<8x128xf32>
    %146 = math.tanh %145 : vector<8x128xf32>
    %147 = arith.mulf %142, %146 : vector<8x128xf32>
    %148 = arith.index_cast %118 : i32 to index
    %c0_46 = arith.constant 0 : index
    %149 = vector.load %arg19[%148, %c0_46] : memref<32x128xf32, #tpu.memory_space<vmem>>, vector<8x128xf32>
    tpu.vector_store %arg19[%148, %c0_46], %147 {strides = array<i32>} : memref<32x128xf32, #tpu.memory_space<vmem>>, vector<8x128xf32>,
    %c4_i32 = arith.constant 4 : i32
    %c0_47 = arith.constant 0 : index
    %c0_48 = arith.constant 0 : index
    %150 = vector.load %arg16[%c0_47, %c0_48] : memref<8x128xf32, #tpu.memory_space<vmem>>, vector<8x128xf32>
    tpu.vector_store %arg16[%c0_47, %c0_48], %147 {strides = array<i32>} : memref<8x128xf32, #tpu.memory_space<vmem>>, vector<8x128xf32>,
    %c0_49 = arith.constant 0 : index
    %c0_50 = arith.constant 0 : index
    %151 = vector.load %arg17[%c0_49, %c0_50] : memref<8x128xf32, #tpu.memory_space<vmem>>, vector<8x128xf32>
    tpu.vector_store %arg17[%c0_49, %c0_50], %145 {strides = array<i32>} : memref<8x128xf32, #tpu.memory_space<vmem>>, vector<8x128xf32>,
    %c0_51 = arith.constant 0 : index
    %c0_52 = arith.constant 0 : index
    %152 = vector.load %arg19[%c0_51, %c0_52] : memref<32x128xf32, #tpu.memory_space<vmem>>, vector<32x128xf32>
    %c0_53 = arith.constant 0 : index
    %c0_54 = arith.constant 0 : index
    %153 = vector.load %arg10[%c0_53, %c0_54] : memref<128x128xf32, #tpu.memory_space<vmem>>, vector<128x128xf32>
    %cst_55 = arith.constant dense<0.000000e+00> : vector<32x128xf32>
    %154 = tpu.matmul %152, %153, %cst_55 {dimension_numbers = #tpu.dot_dimension_numbers<[1], [0], [0], [1], [0, 0, 1, 1], [], []>} : vector<32x128xf32>, vector<128x128xf32>, vector<32x128xf32> -> vector<32x128xf32>
    %c0_56 = arith.constant 0 : index
    %c0_57 = arith.constant 0 : index
    %155 = vector.load %arg11[%c0_56, %c0_57] : memref<1x128xf32, #tpu.memory_space<vmem>>, vector<1x128xf32>
    %156 = vector.broadcast %155 : vector<1x128xf32> to vector<32x128xf32>
    %157 = arith.addf %154, %156 : vector<32x128xf32>
    %c0_58 = arith.constant 0 : index
    %c0_59 = arith.constant 0 : index
    %c0_60 = arith.constant 0 : index
    %158 = vector.load %arg2[%c0_58, %c0_59, %c0_60] : memref<4x8x12xf32, #tpu.memory_space<vmem>>, vector<4x8x12xf32>
    %159 = vector.shape_cast %158 : vector<4x8x12xf32> to vector<32x12xf32>
    %c0_61 = arith.constant 0 : index
    %c0_62 = arith.constant 0 : index
    %160 = vector.load %arg12[%c0_61, %c0_62] : memref<12x128xf32, #tpu.memory_space<vmem>>, vector<12x128xf32>
    %cst_63 = arith.constant dense<0.000000e+00> : vector<32x128xf32>
    %161 = tpu.matmul %159, %160, %cst_63 {dimension_numbers = #tpu.dot_dimension_numbers<[1], [0], [0], [1], [0, 0, 1, 1], [], []>} : vector<32x12xf32>, vector<12x128xf32>, vector<32x128xf32> -> vector<32x128xf32>
    %c0_64 = arith.constant 0 : index
    %c0_65 = arith.constant 0 : index
    %162 = vector.load %arg13[%c0_64, %c0_65] : memref<1x128xf32, #tpu.memory_space<vmem>>, vector<1x128xf32>
    %163 = vector.broadcast %162 : vector<1x128xf32> to vector<32x128xf32>
    %164 = arith.addf %161, %163 : vector<32x128xf32>
    %165 = arith.mulf %157, %164 : vector<32x128xf32>
    %c0_66 = arith.constant 0 : index
    %c0_67 = arith.constant 0 : index
    %166 = vector.load %arg14[%c0_66, %c0_67] : memref<128x6xf32, #tpu.memory_space<vmem>>, vector<128x6xf32>
    %cst_68 = arith.constant dense<0.000000e+00> : vector<32x6xf32>
    %167 = tpu.matmul %165, %166, %cst_68 {dimension_numbers = #tpu.dot_dimension_numbers<[1], [0], [0], [1], [0, 0, 1, 1], [], []>} : vector<32x128xf32>, vector<128x6xf32>, vector<32x6xf32> -> vector<32x6xf32>
    %168 = vector.shape_cast %167 : vector<32x6xf32> to vector<4x8x6xf32>
    %c0_69 = arith.constant 0 : index
    %c0_70 = arith.constant 0 : index
    %c0_71 = arith.constant 0 : index
    %169 = vector.load %arg15[%c0_69, %c0_70, %c0_71] : memref<4x8x6xf32, #tpu.memory_space<vmem>>, vector<4x8x6xf32>
    tpu.vector_store %arg15[%c0_69, %c0_70, %c0_71], %168 {strides = array<i32>} : memref<4x8x6xf32, #tpu.memory_space<vmem>>, vector<4x8x6xf32>,
    return
  }
  func.func @transform_0(%arg0: i32) -> (i32, i32, i32) {
    %c0_i32 = arith.constant 0 : i32
    %c0_i32_0 = arith.constant 0 : i32
    %c0_i32_1 = arith.constant 0 : i32
    return %c0_i32, %arg0, %c0_i32_0 : i32, i32, i32
  }
  func.func @transform_1(%arg0: i32) -> (i32, i32, i32) {
    %c0_i32 = arith.constant 0 : i32
    %c0_i32_0 = arith.constant 0 : i32
    %c0_i32_1 = arith.constant 0 : i32
    return %c0_i32, %arg0, %c0_i32_0 : i32, i32, i32
  }
  func.func @transform_2(%arg0: i32) -> (i32, i32) {
    %c0_i32 = arith.constant 0 : i32
    %c0_i32_0 = arith.constant 0 : i32
    return %arg0, %c0_i32 : i32, i32
  }
  func.func @transform_3(%arg0: i32) -> (i32, i32) {
    %c0_i32 = arith.constant 0 : i32
    %c0_i32_0 = arith.constant 0 : i32
    return %arg0, %c0_i32 : i32, i32
  }
  func.func @transform_4(%arg0: i32) -> (i32, i32) {
    %c0_i32 = arith.constant 0 : i32
    %c0_i32_0 = arith.constant 0 : i32
    %c0_i32_1 = arith.constant 0 : i32
    return %c0_i32, %c0_i32_0 : i32, i32
  }
  func.func @transform_5(%arg0: i32) -> (i32, i32) {
    %c0_i32 = arith.constant 0 : i32
    %c0_i32_0 = arith.constant 0 : i32
    %c0_i32_1 = arith.constant 0 : i32
    return %c0_i32, %c0_i32_0 : i32, i32
  }
  func.func @transform_6(%arg0: i32) -> (i32, i32) {
    %c0_i32 = arith.constant 0 : i32
    %c0_i32_0 = arith.constant 0 : i32
    %c0_i32_1 = arith.constant 0 : i32
    return %c0_i32, %c0_i32_0 : i32, i32
  }
  func.func @transform_7(%arg0: i32) -> (i32, i32) {
    %c0_i32 = arith.constant 0 : i32
    %c0_i32_0 = arith.constant 0 : i32
    %c0_i32_1 = arith.constant 0 : i32
    return %c0_i32, %c0_i32_0 : i32, i32
  }
  func.func @transform_8(%arg0: i32) -> (i32, i32) {
    %c0_i32 = arith.constant 0 : i32
    %c0_i32_0 = arith.constant 0 : i32
    %c0_i32_1 = arith.constant 0 : i32
    return %c0_i32, %c0_i32_0 : i32, i32
  }
  func.func @transform_9(%arg0: i32) -> (i32, i32) {
    %c0_i32 = arith.constant 0 : i32
    %c0_i32_0 = arith.constant 0 : i32
    %c0_i32_1 = arith.constant 0 : i32
    return %c0_i32, %c0_i32_0 : i32, i32
  }
  func.func @transform_10(%arg0: i32) -> (i32, i32) {
    %c0_i32 = arith.constant 0 : i32
    %c0_i32_0 = arith.constant 0 : i32
    %c0_i32_1 = arith.constant 0 : i32
    return %c0_i32, %c0_i32_0 : i32, i32
  }
  func.func @transform_11(%arg0: i32) -> (i32, i32) {
    %c0_i32 = arith.constant 0 : i32
    %c0_i32_0 = arith.constant 0 : i32
    %c0_i32_1 = arith.constant 0 : i32
    return %c0_i32, %c0_i32_0 : i32, i32
  }
  func.func @transform_12(%arg0: i32) -> (i32, i32) {
    %c0_i32 = arith.constant 0 : i32
    %c0_i32_0 = arith.constant 0 : i32
    %c0_i32_1 = arith.constant 0 : i32
    return %c0_i32, %c0_i32_0 : i32, i32
  }
  func.func @transform_13(%arg0: i32) -> (i32, i32) {
    %c0_i32 = arith.constant 0 : i32
    %c0_i32_0 = arith.constant 0 : i32
    %c0_i32_1 = arith.constant 0 : i32
    return %c0_i32, %c0_i32_0 : i32, i32
  }
  func.func @transform_14(%arg0: i32) -> (i32, i32, i32) {
    %c0_i32 = arith.constant 0 : i32
    %c0_i32_0 = arith.constant 0 : i32
    %c0_i32_1 = arith.constant 0 : i32
    return %c0_i32, %arg0, %c0_i32_0 : i32, i32, i32
  }
  func.func @transform_15(%arg0: i32) -> (i32, i32) {
    %c0_i32 = arith.constant 0 : i32
    %c0_i32_0 = arith.constant 0 : i32
    return %arg0, %c0_i32 : i32, i32
  }
  func.func @transform_16(%arg0: i32) -> (i32, i32) {
    %c0_i32 = arith.constant 0 : i32
    %c0_i32_0 = arith.constant 0 : i32
    return %arg0, %c0_i32 : i32, i32
  }
}

</mosaic_0001>

<bundles_post_ra>
// kernel: tpu_custom_call.1
= control target key start
LH: loop header
LB: loop body
LE: loop exit
PB: predicated region body
PF: predicated region fallthrough
CT: control target
= control target key end

     0   :  { %s3135_s0 = inlined_call_operand.hbm [shape: f32[4,8,16], index: 0, kind: input, shape index: {}]   ;;  %s3136_s1 = inlined_call_operand.hbm [shape: f32[4,8,12], index: 1, kind: input, shape index: {}]   ;;  %s3137_s2 = inlined_call_operand.hbm [shape: f32[8,128], index: 2, kind: input, shape index: {}]   ;;  %s3138_s3 = inlined_call_operand.hbm [shape: f32[8,128], index: 3, kind: input, shape index: {}]   ;;  %s3139_s4 = inlined_call_operand.vmem [shape: f32[16,32], index: 4, kind: input, shape index: {}]   ;;  %s3140_s5 = inlined_call_operand.vmem [shape: f32[1,32], index: 5, kind: input, shape index: {}]   ;;  %s3141_s6 = inlined_call_operand.vmem [shape: f32[32,512], index: 6, kind: input, shape index: {}]   ;;  %s3142_s7 = inlined_call_operand.hbm [shape: f32[1,512], index: 7, kind: input, shape index: {}]   ;;  %s3143_s8 = inlined_call_operand.hbm [shape: f32[128,512], index: 8, kind: input, shape index: {}]   ;;  %s3144_s9 = inlined_call_operand.hbm [shape: f32[128,128], index: 9, kind: input, shape index: {}]   ;;  %s3145_s10 = inlined_call_operand.vmem [shape: f32[1,128], index: 10, kind: input, shape index: {}]   ;;  %s3146_s11 = inlined_call_operand.vmem [shape: f32[12,128], index: 11, kind: input, shape index: {}]   ;;  %s3147_s12 = inlined_call_operand.vmem [shape: f32[1,128], index: 12, kind: input, shape index: {}]   ;;  %s3148_s13 = inlined_call_operand.vmem [shape: f32[128,6], index: 13, kind: input, shape index: {}]   ;;  %s3149_s14 = inlined_call_operand.vmem [shape: f32[4,8,6], index: 14, kind: output, shape index: {0}]   ;;  %s3150_s15 = inlined_call_operand.hbm [shape: f32[8,128], index: 15, kind: output, shape index: {1}]   ;;  %s3151_s16 = inlined_call_operand.hbm [shape: f32[8,128], index: 16, kind: output, shape index: {2}]  }
   0x1   :  { %3157 = sst [smem:[#allocation25_spill]] %s3135_s0 }
   0x2   :  { %22 = vsyncpa [#allocation5], 0 }
   0x3   :  { %23 = vsyncpa [#allocation8], 0 }
   0x4   :  { %24 = vsyncpa [#allocation11], 0 }
   0x5   :  { %25 = vsyncpa [#allocation14], 0 }
   0x6   :  { %26 = vsyncpa [#allocation6], 0 }
   0x7   :  { %27 = vsyncpa [#allocation18], 0  ;;  %s2507_s21 = smov [#allocation7]   ;;  %s2508_s23 = smov [#allocation10]  }
   0x8   :  { %s45_s22 = sshll.u32 %s2507_s21, 4  ;;  %s68_s24 = sshll.u32 %s2508_s23, 4  ;;  %s46_s22 = int_to_ptr.vmem [resolvable:$true] %s45_s22  ;;  %s69_s24 = int_to_ptr.vmem [resolvable:$true] %s68_s24 }
   0x9   :  { %s2297_s27 = scalar_lea.hbm %s3136_s1, 512 }
   0xa   :  { %p2298_p0 = scmp.ne.s32.totalorder %s3136_s1, %s2297_s27  ;;  %p2301_p1 = scmp.lt.u32.totalorder %s2297_s27, %s3136_s1 }
   0xc   :  { %p2303_p2 = pnand %p2301_p1, %p2298_p0 }
   0xe   :  { %2306 = shalt.err (!%p2303_p2)
}
   0xf   :  { %s2307_s17 = scalar_lea.vmem %s46_s22, 512  ;;  %p2312_p4 = scmp.lt.s32.totalorder %s46_s22, %s46_s22 }
  0x10   :  { %p2308_p3 = scmp.ne.s32.totalorder %s46_s22, %s2307_s17  ;;  %p2313_p5 = scmp.lt.s32.totalorder %s2307_s17, %s2307_s17 }
  0x12   :  { %p2314_p6 = por %p2313_p5, %p2312_p4 }
  0x14   :  { %p2315_p7 = pnand %p2314_p6, %p2308_p3 }
  0x16   :  { %2318 = shalt.err (!%p2315_p7)
}
  0x17   :  { %s3153_s18 = smov 128   ;;  %s3155_s19 = smov 8  }
  0x18   :  { %51 = dma.hbm_to_vmem [thread:$0]  %s3136_s1, 512, %s46_s22, [#allocation8], %s3153_s18, %s3153_s18, %s3155_s19  }
  0x19   :  { %s2319_s26 = scalar_lea.hbm %s3138_s3, 128 }
  0x1a   :  { %p2320_p8 = scmp.ne.s32.totalorder %s3138_s3, %s2319_s26  ;;  %p2323_p9 = scmp.lt.u32.totalorder %s2319_s26, %s3138_s3 }
  0x1c   :  { %p2325_p10 = pnand %p2323_p9, %p2320_p8 }
  0x1e   :  { %2328 = shalt.err (!%p2325_p10)
}
  0x1f   :  { %s2329_s0 = scalar_lea.vmem %s69_s24, 128  ;;  %p2334_p12 = scmp.lt.s32.totalorder %s69_s24, %s69_s24 }
  0x20   :  { %p2330_p11 = scmp.ne.s32.totalorder %s69_s24, %s2329_s0  ;;  %p2335_p13 = scmp.lt.s32.totalorder %s2329_s0, %s2329_s0 }
  0x22   :  { %p2336_p0 = por %p2335_p13, %p2334_p12 }
  0x24   :  { %p2337_p1 = pnand %p2336_p0, %p2330_p11 }
  0x26   :  { %2340 = shalt.err (!%p2337_p1)
}
  0x27   :  { %71 = dma.hbm_to_vmem [thread:$0]  %s3138_s3, 128, %s69_s24, [#allocation11]  }
  0x28   :  { %s2511_s17 = smov [#allocation13]   ;;  %s2341_s25 = scalar_lea.hbm %s3143_s8, 8192 }
  0x29   :  { %s93_s20 = sshll.u32 %s2511_s17, 4  ;;  %p2342_p2 = scmp.ne.s32.totalorder %s3143_s8, %s2341_s25  ;;  %s94_s20 = int_to_ptr.vmem [resolvable:$true] %s93_s20 }
  0x2a   :  { %p2345_p3 = scmp.lt.u32.totalorder %s2341_s25, %s3143_s8 }
  0x2c   :  { %p2347_p4 = pnand %p2345_p3, %p2342_p2 }
  0x2e   :  { %2350 = shalt.err (!%p2347_p4)
}
  0x2f   :  { %s2351_s30 = scalar_lea.vmem %s94_s20, 8192  ;;  %p2356_p6 = scmp.lt.s32.totalorder %s94_s20, %s94_s20 }
  0x30   :  { %p2352_p5 = scmp.ne.s32.totalorder %s94_s20, %s2351_s30  ;;  %p2357_p7 = scmp.lt.s32.totalorder %s2351_s30, %s2351_s30 }
  0x32   :  { %p2358_p8 = por %p2357_p7, %p2356_p6 }
  0x34   :  { %p2359_p9 = pnand %p2358_p8, %p2352_p5 }
  0x36   :  { %2362 = shalt.err (!%p2359_p9)
}
  0x37   :  { %s2512_s3 = smov 512   ;;  %s2513_s24 = smov 32  }
  0x38   :  { %99 = dma.hbm_to_vmem [thread:$0]  %s3143_s8, 8192, %s94_s20, [#allocation14], %s2512_s3, %s2512_s3, %s2513_s24  }
  0x39   :  { %s2514_s22 = smov [#allocation4]   ;;  %s2515_s21 = smov [#allocation9]  }
  0x3a   :  { %s33_s17 = sshll.u32 %s2514_s22, 4  ;;  %s58_s23 = sshll.u32 %s2515_s21, 4  ;;  %s34_s17 = int_to_ptr.vmem [resolvable:$true] %s33_s17  ;;  %s59_s23 = int_to_ptr.vmem [resolvable:$true] %s58_s23 }
  0x3b   :  { %s3158_s27 = sld [smem:[#allocation25_spill]] }
  0x41   :  { %s2363_s28 = scalar_lea.hbm %s3158_s27, 512 }
  0x42   :  { %p2364_p10 = scmp.ne.s32.totalorder %s3158_s27, %s2363_s28  ;;  %p2367_p11 = scmp.lt.u32.totalorder %s2363_s28, %s3158_s27 }
  0x44   :  { %p2369_p12 = pnand %p2367_p11, %p2364_p10 }
  0x46   :  { %2372 = shalt.err (!%p2369_p12)
}
  0x47   :  { %s2373_s8 = scalar_lea.vmem %s34_s17, 512  ;;  %p2378_p0 = scmp.lt.s32.totalorder %s34_s17, %s34_s17 }
  0x48   :  { %p2374_p13 = scmp.ne.s32.totalorder %s34_s17, %s2373_s8  ;;  %p2379_p1 = scmp.lt.s32.totalorder %s2373_s8, %s2373_s8 }
  0x4a   :  { %p2380_p2 = por %p2379_p1, %p2378_p0 }
  0x4c   :  { %p2381_p3 = pnand %p2380_p2, %p2374_p13 }
  0x4e   :  { %2384 = shalt.err (!%p2381_p3)
}
  0x4f   :  { %s3159_s20 = smov 8   ;;  %s3160_s3 = smov 128  }
  0x50   :  { %39 = dma.hbm_to_vmem [thread:$0]  %s3158_s27, 512, %s34_s17, [#allocation5], %s3160_s3, %s3160_s3, %s3159_s20  }
  0x51   :  { %s2385_s19 = scalar_lea.hbm %s3137_s2, 128 }
  0x52   :  { %p2386_p4 = scmp.ne.s32.totalorder %s3137_s2, %s2385_s19  ;;  %p2389_p5 = scmp.lt.u32.totalorder %s2385_s19, %s3137_s2 }
  0x54   :  { %p2391_p6 = pnand %p2389_p5, %p2386_p4 }
  0x56   :  { %2394 = shalt.err (!%p2391_p6)
}
  0x57   :  { %s2395_s28 = scalar_lea.vmem %s59_s23, 128  ;;  %p2400_p8 = scmp.lt.s32.totalorder %s59_s23, %s59_s23 }
  0x58   :  { %p2396_p7 = scmp.ne.s32.totalorder %s59_s23, %s2395_s28  ;;  %p2401_p9 = scmp.lt.s32.totalorder %s2395_s28, %s2395_s28 }
  0x5a   :  { %p2402_p10 = por %p2401_p9, %p2400_p8 }
  0x5c   :  { %p2403_p11 = pnand %p2402_p10, %p2396_p7 }
  0x5e   :  { %2406 = shalt.err (!%p2403_p11)
}
  0x5f   :  { %61 = dma.hbm_to_vmem [thread:$0]  %s3137_s2, 128, %s59_s23, [#allocation8]  }
  0x60   :  { %s2516_s29 = smov [#allocation12]   ;;  %s2517_s8 = smov [#allocation15]  }
  0x61   :  { %s84_s30 = sshll.u32 %s2516_s29, 4  ;;  %s105_s24 = sshll.u32 %s2517_s8, 4  ;;  %s85_s30 = int_to_ptr.vmem [resolvable:$true] %s84_s30  ;;  %s106_s24 = int_to_ptr.vmem [resolvable:$true] %s105_s24 }
  0x62   :  { %s2407_s18 = scalar_lea.hbm %s3142_s7, 64 }
  0x63   :  { %p2408_p12 = scmp.ne.s32.totalorder %s3142_s7, %s2407_s18  ;;  %p2411_p13 = scmp.lt.u32.totalorder %s2407_s18, %s3142_s7 }
  0x65   :  { %p2413_p0 = pnand %p2411_p13, %p2408_p12 }
  0x67   :  { %2416 = shalt.err (!%p2413_p0)
}
  0x68   :  { %s2417_s2 = scalar_lea.vmem %s85_s30, 64  ;;  %p2422_p2 = scmp.lt.s32.totalorder %s85_s30, %s85_s30 }
  0x69   :  { %p2418_p1 = scmp.ne.s32.totalorder %s85_s30, %s2417_s2  ;;  %p2423_p3 = scmp.lt.s32.totalorder %s2417_s2, %s2417_s2 }
  0x6b   :  { %p2424_p4 = por %p2423_p3, %p2422_p2 }
  0x6d   :  { %p2425_p5 = pnand %p2424_p4, %p2418_p1 }
  0x6f   :  { %2428 = shalt.err (!%p2425_p5)
}
  0x70   :  { %87 = dma.hbm_to_vmem [thread:$0]  %s3142_s7, 64, %s85_s30, [#allocation11]  }
  0x71   :  { %s2429_s27 = scalar_lea.hbm %s3144_s9, 2048 }
  0x72   :  { %p2430_p6 = scmp.ne.s32.totalorder %s3144_s9, %s2429_s27  ;;  %p2433_p7 = scmp.lt.u32.totalorder %s2429_s27, %s3144_s9 }
  0x74   :  { %p2435_p8 = pnand %p2433_p7, %p2430_p6 }
  0x76   :  { %2438 = shalt.err (!%p2435_p8)
}
  0x77   :  { %s2439_s18 = scalar_lea.vmem %s106_s24, 2048  ;;  %p2444_p10 = scmp.lt.s32.totalorder %s106_s24, %s106_s24 }
  0x78   :  { %p2440_p9 = scmp.ne.s32.totalorder %s106_s24, %s2439_s18  ;;  %p2445_p11 = scmp.lt.s32.totalorder %s2439_s18, %s2439_s18 }
  0x7a   :  { %p2446_p12 = por %p2445_p11, %p2444_p10 }
  0x7c   :  { %p2447_p13 = pnand %p2446_p12, %p2440_p9 }
  0x7e   :  { %2450 = shalt.err (!%p2447_p13)
}
  0x7f   :  { %111 = dma.hbm_to_vmem [thread:$0]  %s3144_s9, 2048, %s106_s24, [#allocation14], %s3160_s3, %s3160_s3, %s3159_s20  }
  0x80   :  { %2495 = dma.done.wait [#allocation5], 512  }
  0x81   :  { %2496 = vsyncadd [#allocation5], 4294966784 }
  0x82   :  { %2497 = dma.done.wait [#allocation8], 640  }
  0x83   :  { %2498 = vsyncadd [#allocation8], 4294966656 }
  0x84   :  { %2499 = dma.done.wait [#allocation11], 192  }
  0x85   :  { %2500 = vsyncadd [#allocation11], 4294967104 }
  0x86   :  { %2501 = dma.done.wait [#allocation14], 10240  }
  0x87   :  { %2502 = vsyncadd [#allocation14], 4294957056  ;;  %vm154_vm0 = vcmask 130048   ;;  %v145_v0 = vld [vmem:[%s3139_s4] sm:$0xff]  ;;  %v146_v1 = vld [vmem:[%s3139_s4 + $0x8] sm:$0xff]  ;;  %v2518_v37 = vmov 0.0  }
  0x88   :  { %v141_v2 = vld [vmem:[#allocation4] sm:$0xff]  ;;  %v1840_v3 = vpack.c.bf16 %v146_v1, %v145_v0  ;;  %v257_v4 = vld [vmem:[%s3141_s6 + $0x8] sm:$0xff]  ;;  %v259_v6 = vld [vmem:[%s3141_s6 + $0x18] sm:$0xff]  ;;  %460 = vmatprep.mubr.f32.mxu0 %v2518_v37  ;;  %vm294_vm1 = vcmask 261120   ;;  %vm1422_vm2 = vcmask 1043456   ;;  %vm2519_vm3 = vmmov 1  }
  0x89   :  { %1748 = vmatprep.mubr.msk.f32.mxu1 %vm154_vm0, %v141_v2  ;;  %v261_v5 = vld [vmem:[%s3141_s6 + $0x28] sm:$0xff]  ;;  %v263_v8 = vld [vmem:[%s3141_s6 + $0x38] sm:$0xff]  ;;  %v256_v9 = vld [vmem:[%s3141_s6] sm:$0xff]  ;;  %vm1409_vm5 = vcmask 97280   ;;  %vm1616_vm6 = vcmask 48128   ;;  %s2520_s24 = smov [#allocation16]  }
  0x8a   :  { %1841 = vmatprep.subr.bf16.mxu1 %v1840_v3  ;;  %v1844_v7 = vpack.c.bf16 %v261_v5, %v257_v4  ;;  %v260_v10 = vld [vmem:[%s3141_s6 + $0x20] sm:$0xff]  ;;  %v142_v11 = vld [vmem:[#allocation4 + $0x8] sm:$0xff]  ;;  %v1852_v12 = vpack.c.bf16 %v263_v8, %v259_v6  ;;  %v258_v14 = vld [vmem:[%s3141_s6 + $0x10] sm:$0xff]  ;;  %s1629_s2 = sshll.u32 %s2520_s24, 4  ;;  %s2521_s23 = smov [#allocation17]   ;;  %s1630_s2 = int_to_ptr.vmem [resolvable:$true] %s1629_s2 }
  0x8b   :  { %1843 = vmatpush3.bf16.msra.mxu1 %v1840_v3  ;;  %v1846_v13 = vpack.c.bf16 %v260_v10, %v256_v9  ;;  %v262_v15 = vld [vmem:[%s3141_s6 + $0x30] sm:$0xff]  ;;  %v144_v18 = vld [vmem:[#allocation4 + $0x18] sm:$0xff]  ;;  %v265_v19 = vld [vmem:[%s3141_s6 + $0x48] sm:$0xff]  ;;  %s1639_s26 = sshll.u32 %s2521_s23, 4  ;;  %s2451_s4 = scalar_lea.vmem %s1630_s2, 128  ;;  %s1640_s26 = int_to_ptr.vmem [resolvable:$true] %s1639_s26 }
  0x8c   :  { %v143_v16 = vld [vmem:[#allocation4 + $0x10] sm:$0xff]  ;;  %1845 = vmatprep.subr.bf16.mxu1 %v1844_v7  ;;  %v1854_v17 = vpack.c.bf16 %v262_v15, %v258_v14  ;;  %1853 = vmatprep.subr.bf16.mxu0 %v1852_v12  ;;  %v269_v20 = vld [vmem:[%s3141_s6 + $0x68] sm:$0xff]  ;;  %v267_v21 = vld [vmem:[%s3141_s6 + $0x58] sm:$0xff]  ;;  %p2452_p0 = scmp.ne.s32.totalorder %s1630_s2, %s2451_s4  ;;  %p2456_p1 = scmp.lt.s32.totalorder %s1630_s2, %s1630_s2 }
  0x8d   :  { %v1848_v22 = vpack.c.bf16 %v269_v20, %v265_v19  ;;  %v271_v23 = vld [vmem:[%s3141_s6 + $0x78] sm:$0xff]  ;;  %v264_v24 = vld [vmem:[%s3141_s6 + $0x40] sm:$0xff]  ;;  %v266_v28 = vld [vmem:[%s3141_s6 + $0x50] sm:$0xff]  ;;  %p2457_p2 = scmp.lt.s32.totalorder %s2451_s4, %s2451_s4 }
  0x8e   :  { %1749 = vmatmul.mubr.msk.f32.vlgmr.msra.gmra.mrb[0].mxu1 %vm154_vm0, %v142_v11  ;;  %1855 = vmatpush1.bf16.msra.mxu0 %v1854_v17  ;;  %v268_v25 = vld [vmem:[%s3141_s6 + $0x60] sm:$0xff]  ;;  %v1856_v26 = vpack.c.bf16 %v271_v23, %v267_v21  ;;  %v270_v29 = vld [vmem:[%s3141_s6 + $0x70] sm:$0xff]  ;;  %vm3014_vm4 = vmpackc.low %vm1422_vm2, %vm2519_vm3 }
  0x8f   :  { %1751 = vmatprep.mubr.msk.f32.mxu1 %vm154_vm0, %v143_v16  ;;  %1847 = vmatpush1.bf16.msra.mxu1 %v1846_v13  ;;  %v1850_v27 = vpack.c.bf16 %v268_v25, %v264_v24  ;;  %v1858_v30 = vpack.c.bf16 %v270_v29, %v266_v28  ;;  %v502_v31 = vld [vmem:[#allocation13 + $0x8] sm:$0xff]  ;;  %v504_v33 = vld [vmem:[#allocation13 + $0x18] sm:$0xff]  ;;  %v501_v39 = vld [vmem:[#allocation13] sm:$0xff]  ;;  %p2458_p3 = por %p2457_p2, %p2456_p1 }
  0x90   :  { %1849 = vmatprep.subr.bf16.mxu1 %v1848_v22  ;;  %1857 = vmatprep.subr.bf16.mxu0 %v1856_v26  ;;  %v506_v32 = vld [vmem:[#allocation13 + $0x28] sm:$0xff]  ;;  %v508_v35 = vld [vmem:[#allocation13 + $0x38] sm:$0xff]  ;;  %v505_v41 = vld [vmem:[#allocation13 + $0x20] sm:$0xff] }
  0x91   :  { %v2758_v34 = vpack.c.bf16 %v506_v32, %v502_v31  ;;  %v2760_v36 = vpack.c.bf16 %v508_v35, %v504_v33  ;;  %v1660_v38 = vld [vmem:[%s3140_s5] ss:$0 sm:$0xff]  ;;  %v503_v42 = vld [vmem:[#allocation13 + $0x10] sm:$0xff]  ;;  %v512_v48 = vld [vmem:[#allocation13 + $0x58] sm:$0xff]  ;;  %v2769_v50 = vpack.c.bf16 %v505_v41, %v501_v39  ;;  %p2459_p4 = pnand %p2458_p3, %p2452_p0 }
  0x92   :  { %1752 = vmatmul.mubr.msk.f32.gmra.mrb[2].mxu1 %vm154_vm0, %v144_v18  ;;  %1859 = vmatpush1.bf16.msra.mxu0 %v1858_v30  ;;  %v507_v43 = vld [vmem:[#allocation13 + $0x30] sm:$0xff]  ;;  %v510_v45 = vld [vmem:[#allocation13 + $0x48] sm:$0xff]  ;;  %v516_v49 = vld [vmem:[#allocation13 + $0x78] sm:$0xff] }
  0x93   :  { %1851 = vmatpush1.bf16.msra.mxu1 %v1850_v27  ;;  %371 = vmatprep.mubr.f32.mxu1 %v2518_v37  ;;  %v514_v47 = vld [vmem:[#allocation13 + $0x68] sm:$0xff]  ;;  %v2771_v51 = vpack.c.bf16 %v507_v43, %v503_v42  ;;  %v509_v52 = vld [vmem:[#allocation13 + $0x40] sm:$0xff]  ;;  %v511_v56 = vld [vmem:[#allocation13 + $0x50] sm:$0xff]  ;;  %v2775_v61 = vpack.c.bf16 %v516_v49, %v512_v48 }
  0x94   :  { %1861 = vmatprep.subr.bf16.mxu1 %v2758_v34  ;;  %1893 = vmatprep.subr.bf16.mxu0 %v2760_v36  ;;  %v513_v53 = vld [vmem:[#allocation13 + $0x60] sm:$0xff]  ;;  %v515_v57 = vld [vmem:[#allocation13 + $0x70] sm:$0xff]  ;;  %v518_v58 = vld [vmem:[#allocation13 + $0x88] sm:$0xff]  ;;  %v2773_v60 = vpack.c.bf16 %v514_v47, %v510_v45 }
  0x95   :  { %v522_v62 = vld [vmem:[#allocation13 + $0xa8] sm:$0xff]  ;;  %v520_v63 = vld [vmem:[#allocation13 + $0x98] sm:$0xff]  ;;  %v2781_v3 = vpack.c.bf16 %v513_v53, %v509_v52  ;;  %v2783_v4 = vpack.c.bf16 %v515_v57, %v511_v56  ;;  %v517_v5 = vld [vmem:[#allocation13 + $0x80] sm:$0xff] }
  0x96   :  { %v524_v0 = vld [vmem:[#allocation13 + $0xb8] sm:$0xff]  ;;  %v521_v6 = vld [vmem:[#allocation13 + $0xa0] sm:$0xff]  ;;  %v2787_v8 = vpack.c.bf16 %v522_v62, %v518_v58  ;;  %v519_v10 = vld [vmem:[#allocation13 + $0x90] sm:$0xff] }
  0x97   :  { %v2789_v9 = vpack.c.bf16 %v524_v0, %v520_v63  ;;  %v523_v11 = vld [vmem:[#allocation13 + $0xb0] sm:$0xff]  ;;  %v526_v12 = vld [vmem:[#allocation13 + $0xc8] sm:$0xff]  ;;  %v528_v14 = vld [vmem:[#allocation13 + $0xd8] sm:$0xff]  ;;  %v2797_v18 = vpack.c.bf16 %v521_v6, %v517_v5 }
  0x98   :  { %v530_v13 = vld [vmem:[#allocation13 + $0xe8] sm:$0xff]  ;;  %v532_v15 = vld [vmem:[#allocation13 + $0xf8] sm:$0xff]  ;;  %v2799_v19 = vpack.c.bf16 %v523_v11, %v519_v10  ;;  %v525_v20 = vld [vmem:[#allocation13 + $0xc0] sm:$0xff] }
  0x99   :  { %v529_v21 = vld [vmem:[#allocation13 + $0xe0] sm:$0xff]  ;;  %v2803_v22 = vpack.c.bf16 %v530_v13, %v526_v12  ;;  %v2805_v23 = vpack.c.bf16 %v532_v15, %v528_v14  ;;  %v527_v24 = vld [vmem:[#allocation13 + $0xd0] sm:$0xff]  ;;  %v534_v26 = vld [vmem:[#allocation13 + $0x108] sm:$0xff] }
  0x9a   :  { %v531_v25 = vld [vmem:[#allocation13 + $0xf0] sm:$0xff]  ;;  %v538_v27 = vld [vmem:[#allocation13 + $0x128] sm:$0xff]  ;;  %v536_v28 = vld [vmem:[#allocation13 + $0x118] sm:$0xff]  ;;  %v2813_v31 = vpack.c.bf16 %v529_v21, %v525_v20 }
  0x9b   :  { %v540_v29 = vld [vmem:[#allocation13 + $0x138] sm:$0xff]  ;;  %v2815_v32 = vpack.c.bf16 %v531_v25, %v527_v24  ;;  %v533_v33 = vld [vmem:[#allocation13 + $0x100] sm:$0xff]  ;;  %v539_v41 = vld [vmem:[#allocation13 + $0x130] sm:$0xff] }
  0x9c   :  { %v537_v35 = vld [vmem:[#allocation13 + $0x120] sm:$0xff]  ;;  %v2821_v39 = vpack.c.bf16 %v540_v29, %v536_v28  ;;  %v542_v42 = vld [vmem:[#allocation13 + $0x148] sm:$0xff]  ;;  %v548_v45 = vld [vmem:[#allocation13 + $0x178] sm:$0xff]  ;;  %v274_v29 = vlaneseq }
  0x9d   :  { %v546_v43 = vld [vmem:[#allocation13 + $0x168] sm:$0xff]  ;;  %v541_v48 = vld [vmem:[#allocation13 + $0x140] sm:$0xff]  ;;  %v552_v58 = vld [vmem:[#allocation13 + $0x198] sm:$0xff] }
  0x9e   :  { %v545_v49 = vld [vmem:[#allocation13 + $0x160] sm:$0xff]  ;;  %v2835_v52 = vpack.c.bf16 %v546_v43, %v542_v42  ;;  %v550_v56 = vld [vmem:[#allocation13 + $0x188] sm:$0xff]  ;;  %v551_v6 = vld [vmem:[#allocation13 + $0x190] sm:$0xff] }
  0x9f   :  { %v554_v57 = vld [vmem:[#allocation13 + $0x1a8] sm:$0xff]  ;;  %v2843_v62 = vpack.c.bf16 %v545_v49, %v541_v48  ;;  %v549_v0 = vld [vmem:[#allocation13 + $0x180] sm:$0xff]  ;;  %v560_v12 = vld [vmem:[#allocation13 + $0x1d8] sm:$0xff] }
  0xa0   :  { %v558_v10 = vld [vmem:[#allocation13 + $0x1c8] sm:$0xff]  ;;  %v564_v13 = vld [vmem:[#allocation13 + $0x1f8] sm:$0xff]  ;;  %v561_v21 = vld [vmem:[#allocation13 + $0x1e0] sm:$0xff] }
  0xa1   :  { %v562_v11 = vld [vmem:[#allocation13 + $0x1e8] sm:$0xff]  ;;  %v2863_v20 = vpack.c.bf16 %v564_v13, %v560_v12  ;;  %v559_v24 = vld [vmem:[#allocation13 + $0x1d0] sm:$0xff] }
  0xa2   :  { %v563_v25 = vld [vmem:[#allocation13 + $0x1f0] sm:$0xff] }
  0xa3   :  { %v565_v28 = vld [vmem:[#allocation9] sm:$0xff] }
 0x161   :  { %v1750_v40 = vpop.f32.mrb[0].mxu1 }
 0x162   :  { %v233_v44 = vpop.f32.mrb[1].mxu1  ;;  %v239_v54 = vadd.f32 %v1750_v40, %v1660_v38  ;;  %v535_v40 = vld [vmem:[#allocation13 + $0x110] sm:$0xff] }
 0x163   :  { %v234_v46 = vadd.f32 %v1660_v38, %v233_v44  ;;  %v544_v44 = vld [vmem:[#allocation13 + $0x158] sm:$0xff]  ;;  %v2831_v47 = vpack.c.bf16 %v539_v41, %v535_v40 }
 0x164   :  { %v253_v7 = vmax.f32 %v239_v54, 0.0  ;;  %v2837_v53 = vpack.c.bf16 %v548_v45, %v544_v44  ;;  %v543_v54 = vld [vmem:[#allocation13 + $0x150] sm:$0xff] }
 0x165   :  { %v252_v55 = vmax.f32 %v234_v46, 0.0  ;;  %v1753_v59 = vpop.f32.mrb[2].mxu1  ;;  %v2829_v46 = vpack.c.bf16 %v537_v35, %v533_v33  ;;  %v272_v35 = vld [vmem:[#allocation12] sm:$0xf] }
 0x166   :  { %v243_v1 = vpop.f32.mrb[3].mxu1  ;;  %v249_v16 = vadd.f32 %v1753_v59, %v1660_v38  ;;  %v556_v59 = vld [vmem:[#allocation13 + $0x1b8] sm:$0xff] }
 0x167   :  { %1665 = vmatmul.mubr.msk.f32.vlgmr.msra.gmra.mrb[4].mxu1 %vm294_vm1, %v252_v55  ;;  %1669 = vmatmul.mubr.msk.f32.vlgmr.msra.gmra.mrb[0].mxu0 %vm294_vm1, %v252_v55  ;;  %v244_v2 = vadd.f32 %v1660_v38, %v243_v1  ;;  %v2819_v38 = vpack.c.bf16 %v538_v27, %v534_v26  ;;  %v547_v55 = vld [vmem:[#allocation13 + $0x170] sm:$0xff]  ;;  %v553_v1 = vld [vmem:[#allocation13 + $0x1a0] sm:$0xff]  ;;  %v2851_v5 = vpack.c.bf16 %v556_v59, %v552_v58 }
 0x168   :  { %1863 = vmatpush1.bf16.msra.mxu1 %v2769_v50  ;;  %1895 = vmatpush1.bf16.msra.mxu0 %v2771_v51  ;;  %v255_v30 = vmax.f32 %v249_v16, 0.0  ;;  %v2845_v63 = vpack.c.bf16 %v547_v55, %v543_v54  ;;  %v2855_v14 = vpack.c.bf16 %v553_v1, %v549_v0  ;;  %v557_v16 = vld [vmem:[#allocation13 + $0x1c0] sm:$0xff]  ;;  %v2869_v27 = vpack.c.bf16 %v563_v25, %v559_v24  ;;  %v566_v24 = vld [vmem:[#allocation10] sm:$0xff] }
 0x169   :  { %377 = vmatprep.mubr.f32.mxu1 %v2518_v37  ;;  %466 = vmatprep.mubr.f32.mxu0 %v2518_v37  ;;  %v254_v17 = vmax.f32 %v244_v2, 0.0  ;;  %v2849_v2 = vpack.c.bf16 %v554_v57, %v550_v56  ;;  %v2867_v26 = vpack.c.bf16 %v561_v21, %v557_v16 }
 0x16a   :  { %1865 = vmatprep.subr.bf16.mxu1 %v2773_v60  ;;  %1897 = vmatprep.subr.bf16.mxu0 %v2775_v61 }
 0x16b   :  { %1666 = vmatmul.mubr.msk.f32.gmra.mrb[6].mxu1 %vm294_vm1, %v253_v7  ;;  %1670 = vmatmul.mubr.msk.f32.gmra.mrb[2].mxu0 %vm294_vm1, %v253_v7  ;;  %v555_v7 = vld [vmem:[#allocation13 + $0x1b0] sm:$0xff] }
 0x16c   :  { %1867 = vmatpush1.bf16.msra.mxu1 %v2781_v3  ;;  %1899 = vmatpush1.bf16.msra.mxu0 %v2783_v4  ;;  %v2857_v15 = vpack.c.bf16 %v555_v7, %v551_v6 }
 0x16d   :  { %1869 = vmatprep.subr.bf16.mxu1 %v2787_v8  ;;  %1901 = vmatprep.subr.bf16.mxu0 %v2789_v9 }
 0x16e   :  { %383 = vmatprep.mubr.f32.mxu1 %v2518_v37  ;;  %472 = vmatprep.mubr.f32.mxu0 %v2518_v37 }
 0x16f   :  { %1667 = vmatmul.mubr.msk.f32.gmra.mrb[8].mxu1 %vm294_vm1, %v254_v17  ;;  %1671 = vmatmul.mubr.msk.f32.gmra.mrb[4].mxu0 %vm294_vm1, %v254_v17  ;;  %v2861_v17 = vpack.c.bf16 %v562_v11, %v558_v10 }
 0x170   :  { %1871 = vmatpush1.bf16.msra.mxu1 %v2797_v18  ;;  %1903 = vmatpush1.bf16.msra.mxu0 %v2799_v19 }
 0x171   :  { %1873 = vmatprep.subr.bf16.mxu1 %v2803_v22  ;;  %1905 = vmatprep.subr.bf16.mxu0 %v2805_v23 }
 0x172   :  { %389 = vmatprep.mubr.f32.mxu1 %v2518_v37  ;;  %478 = vmatprep.mubr.f32.mxu0 %v2518_v37 }
 0x173   :  { %1668 = vmatmul.mubr.msk.f32.gmra.mrb[10].mxu1 %vm294_vm1, %v255_v30  ;;  %1672 = vmatmul.mubr.msk.f32.gmra.mrb[6].mxu0 %vm294_vm1, %v255_v30  ;;  %v275_v30 = vshrl.u32 %v274_v29, 7 }
 0x174   :  { %1875 = vmatpush1.bf16.msra.mxu1 %v2813_v31  ;;  %1907 = vmatpush1.bf16.msra.mxu0 %v2815_v32 }
 0x175   :  { %1877 = vmatprep.subr.bf16.mxu1 %v2819_v38  ;;  %1909 = vmatprep.subr.bf16.mxu0 %v2821_v39  ;;  %v276_v33 = vsub.s32 0, %v275_v30  ;;  %v280_v40 = vsub.s32 1, %v275_v30  ;;  %v288_v45 = vsub.s32 3, %v275_v30  ;;  %v284_v59 = vsub.s32 2, %v275_v30 }
 0x176   :  { %638 = vmatprep.mubr.f32.mxu1 %v2518_v37  ;;  %709 = vmatprep.mubr.f32.mxu0 %v2518_v37 }
 0x177   :  { %v2911_v41 = vrot.slane %v272_v35, %v276_v33  ;;  %v2913_v42 = vrot.slane %v272_v35, %v280_v40  ;;  %v2917_v58 = vrot.slane %v272_v35, %v288_v45  ;;  %v2920_v1 = vrot.slane %v272_v35, %v284_v59 }
 0x178   :  { %1879 = vmatpush1.bf16.msra.mxu1 %v2829_v46  ;;  %1911 = vmatpush1.bf16.msra.mxu0 %v2831_v47 }
 0x179   :  { %1881 = vmatprep.subr.bf16.mxu1 %v2835_v52  ;;  %1913 = vmatprep.subr.bf16.mxu0 %v2837_v53 }
 0x17c   :  { %1883 = vmatpush1.bf16.msra.mxu1 %v2843_v62  ;;  %1915 = vmatpush1.bf16.msra.mxu0 %v2845_v63 }
 0x17d   :  { %1885 = vmatprep.subr.bf16.mxu1 %v2849_v2  ;;  %1917 = vmatprep.subr.bf16.mxu0 %v2851_v5 }
 0x180   :  { %1887 = vmatpush1.bf16.msra.mxu1 %v2855_v14  ;;  %1919 = vmatpush1.bf16.msra.mxu0 %v2857_v15 }
 0x181   :  { %1889 = vmatprep.subr.bf16.mxu1 %v2861_v17  ;;  %1921 = vmatprep.subr.bf16.mxu0 %v2863_v20 }
 0x184   :  { %1891 = vmatpush1.bf16.msra.mxu1 %v2867_v26  ;;  %1923 = vmatpush1.bf16.msra.mxu0 %v2869_v27 }
 0x185   :  { %1925 = vmatprep.subr.bf16.mxu1 %v2758_v34  ;;  %1957 = vmatprep.subr.bf16.mxu0 %v2760_v36 }
 0x187   :  { %639 = vmatmul.mubr.f32.vlgmr.msra.gmra.mrb[4].mxu1 %v565_v28  ;;  %710 = vmatmul.mubr.f32.vlgmr.msra.gmra.mrb[0].mxu0 %v565_v28 }
 0x188   :  { %1927 = vmatpush1.bf16.msra.mxu1 %v2769_v50  ;;  %1959 = vmatpush1.bf16.msra.mxu0 %v2771_v51 }
 0x189   :  { %1929 = vmatprep.subr.bf16.mxu1 %v2773_v60  ;;  %1961 = vmatprep.subr.bf16.mxu0 %v2775_v61 }
 0x18a   :  { %816 = vmatprep.mubr.f32.mxu1 %v2518_v37  ;;  %887 = vmatprep.mubr.f32.mxu0 %v2518_v37 }
 0x18c   :  { %1931 = vmatpush1.bf16.msra.mxu1 %v2781_v3  ;;  %1963 = vmatpush1.bf16.msra.mxu0 %v2783_v4 }
 0x18d   :  { %1933 = vmatprep.subr.bf16.mxu1 %v2787_v8  ;;  %1965 = vmatprep.subr.bf16.mxu0 %v2789_v9 }
 0x190   :  { %1935 = vmatpush1.bf16.msra.mxu1 %v2797_v18  ;;  %1967 = vmatpush1.bf16.msra.mxu0 %v2799_v19 }
 0x191   :  { %1937 = vmatprep.subr.bf16.mxu1 %v2803_v22  ;;  %1969 = vmatprep.subr.bf16.mxu0 %v2805_v23 }
 0x194   :  { %1939 = vmatpush1.bf16.msra.mxu1 %v2813_v31  ;;  %1971 = vmatpush1.bf16.msra.mxu0 %v2815_v32 }
 0x195   :  { %1941 = vmatprep.subr.bf16.mxu1 %v2819_v38  ;;  %1973 = vmatprep.subr.bf16.mxu0 %v2821_v39 }
 0x198   :  { %1943 = vmatpush1.bf16.msra.mxu1 %v2829_v46  ;;  %1975 = vmatpush1.bf16.msra.mxu0 %v2831_v47 }
 0x199   :  { %1945 = vmatprep.subr.bf16.mxu1 %v2835_v52  ;;  %1977 = vmatprep.subr.bf16.mxu0 %v2837_v53 }
 0x19c   :  { %1947 = vmatpush1.bf16.msra.mxu1 %v2843_v62  ;;  %1979 = vmatpush1.bf16.msra.mxu0 %v2845_v63 }
 0x19d   :  { %1949 = vmatprep.subr.bf16.mxu1 %v2849_v2  ;;  %1981 = vmatprep.subr.bf16.mxu0 %v2851_v5 }
 0x1a0   :  { %1951 = vmatpush1.bf16.msra.mxu1 %v2855_v14  ;;  %1983 = vmatpush1.bf16.msra.mxu0 %v2857_v15 }
 0x1a1   :  { %1953 = vmatprep.subr.bf16.mxu1 %v2861_v17  ;;  %1985 = vmatprep.subr.bf16.mxu0 %v2863_v20 }
 0x1a4   :  { %1955 = vmatpush1.bf16.msra.mxu1 %v2867_v26  ;;  %1987 = vmatpush1.bf16.msra.mxu0 %v2869_v27 }
 0x1a5   :  { %1989 = vmatprep.subr.bf16.mxu1 %v2758_v34  ;;  %2021 = vmatprep.subr.bf16.mxu0 %v2760_v36 }
 0x25a   :  { %v640_v43 = vpop.f32.mrb[4].mxu1  ;;  %v711_v44 = vpop.f32.mrb[0].mxu0 }
 0x25b   :  { %v2186_v48 = vadd.f32 %v640_v43, %v2911_v41  ;;  %v642_v49 = vpop.f32.mrb[5].mxu1  ;;  %v713_v54 = vpop.f32.mrb[1].mxu0  ;;  %v2194_v7 = vadd.f32 %v711_v44, %v2920_v1 }
 0x25c   :  { %v2187_v55 = vadd.f32 %v642_v49, %v2913_v42  ;;  %v2195_v0 = vadd.f32 %v713_v54, %v2917_v58 }
 0x25d   :  { %v1673_v56 = vmul.f32 -1.442695, %v2186_v48 }
 0x25e   :  { %v1674_v57 = vmul.f32 -1.442695, %v2187_v55  ;;  %v1675_v6 = vmul.f32 -1.442695, %v2195_v0 }
 0x25f   :  { %2233 = vpow2.f32 %v1673_v56 }
 0x260   :  { %2235 = vpow2.f32 %v1674_v57 }
 0x261   :  { %2237 = vpow2.f32 %v1675_v6 }
 0x262   :  { %2239 = vtanh.f32 %v2194_v7 }
 0x269   :  { %v2234_v10 = vpop.eup %2233 }
 0x26a   :  { %v2236_v11 = vpop.eup %2235  ;;  %v723_v12 = vadd.f32 1.0, %v2234_v10 }
 0x26b   :  { %v729_v13 = vadd.f32 1.0, %v2236_v11  ;;  %v2238_v16 = vpop.eup %2237 }
 0x26c   :  { %2241 = vrcp.f32 %v723_v12  ;;  %v2240_v21 = vpop.eup %2239  ;;  %v736_v30 = vadd.f32 1.0, %v2238_v16 }
 0x26d   :  { %2243 = vrcp.f32 %v729_v13 }
 0x26e   :  { %2245 = vrcp.f32 %v736_v30 }
 0x276   :  { %v2242_v25 = vpop.eup %2241 }
 0x277   :  { %v2244_v28 = vpop.eup %2243  ;;  %v740_v29 = vmul.f32 %v2242_v25, %v2240_v21 }
 0x278   :  { %v739_v33 = vmul.f32 %v2244_v28, %v566_v24  ;;  %v2246_v40 = vpop.eup %2245 }
 0x27a   :  { %v2923_v35 = vadd.f32 %v740_v29, %v739_v33 }
 0x27c   :  { %2247 = vtanh.f32 %v2923_v35 }
 0x286   :  { %v2248_v43 = vpop.eup %2247 }
 0x287   :  { %v2926_v44 = vmul.f32 %v2248_v43, %v2246_v40 }
 0x289   :  { %817 = vmatmul.mubr.f32.vlgmr.msra.gmra.mrb[6].mxu1 %v2926_v44  ;;  %888 = vmatmul.mubr.f32.vlgmr.msra.gmra.mrb[2].mxu0 %v2926_v44 }
 0x28a   :  { %1991 = vmatpush1.bf16.msra.mxu1 %v2769_v50  ;;  %2023 = vmatpush1.bf16.msra.mxu0 %v2771_v51 }
 0x28b   :  { %1993 = vmatprep.subr.bf16.mxu1 %v2773_v60  ;;  %2025 = vmatprep.subr.bf16.mxu0 %v2775_v61 }
 0x28c   :  { %995 = vmatprep.mubr.f32.mxu1 %v2518_v37  ;;  %1066 = vmatprep.mubr.f32.mxu0 %v2518_v37 }
 0x28e   :  { %1995 = vmatpush1.bf16.msra.mxu1 %v2781_v3  ;;  %2027 = vmatpush1.bf16.msra.mxu0 %v2783_v4 }
 0x28f   :  { %1997 = vmatprep.subr.bf16.mxu1 %v2787_v8  ;;  %2029 = vmatprep.subr.bf16.mxu0 %v2789_v9 }
 0x292   :  { %1999 = vmatpush1.bf16.msra.mxu1 %v2797_v18  ;;  %2031 = vmatpush1.bf16.msra.mxu0 %v2799_v19 }
 0x293   :  { %2001 = vmatprep.subr.bf16.mxu1 %v2803_v22  ;;  %2033 = vmatprep.subr.bf16.mxu0 %v2805_v23 }
 0x296   :  { %2003 = vmatpush1.bf16.msra.mxu1 %v2813_v31  ;;  %2035 = vmatpush1.bf16.msra.mxu0 %v2815_v32 }
 0x297   :  { %2005 = vmatprep.subr.bf16.mxu1 %v2819_v38  ;;  %2037 = vmatprep.subr.bf16.mxu0 %v2821_v39 }
 0x29a   :  { %2007 = vmatpush1.bf16.msra.mxu1 %v2829_v46  ;;  %2039 = vmatpush1.bf16.msra.mxu0 %v2831_v47 }
 0x29b   :  { %2009 = vmatprep.subr.bf16.mxu1 %v2835_v52  ;;  %2041 = vmatprep.subr.bf16.mxu0 %v2837_v53 }
 0x29e   :  { %2011 = vmatpush1.bf16.msra.mxu1 %v2843_v62  ;;  %2043 = vmatpush1.bf16.msra.mxu0 %v2845_v63 }
 0x29f   :  { %2013 = vmatprep.subr.bf16.mxu1 %v2849_v2  ;;  %2045 = vmatprep.subr.bf16.mxu0 %v2851_v5 }
 0x2a2   :  { %2015 = vmatpush1.bf16.msra.mxu1 %v2855_v14  ;;  %2047 = vmatpush1.bf16.msra.mxu0 %v2857_v15 }
 0x2a3   :  { %2017 = vmatprep.subr.bf16.mxu1 %v2861_v17  ;;  %2049 = vmatprep.subr.bf16.mxu0 %v2863_v20 }
 0x2a6   :  { %2019 = vmatpush1.bf16.msra.mxu1 %v2867_v26  ;;  %2051 = vmatpush1.bf16.msra.mxu0 %v2869_v27 }
 0x2a7   :  { %2053 = vmatprep.subr.bf16.mxu1 %v2758_v34  ;;  %2085 = vmatprep.subr.bf16.mxu0 %v2760_v36 }
 0x35c   :  { %v818_v45 = vpop.f32.mrb[6].mxu1  ;;  %v889_v48 = vpop.f32.mrb[2].mxu0 }
 0x35d   :  { %v2188_v49 = vadd.f32 %v818_v45, %v2911_v41  ;;  %v820_v54 = vpop.f32.mrb[7].mxu1  ;;  %v891_v55 = vpop.f32.mrb[3].mxu0  ;;  %v2196_v7 = vadd.f32 %v889_v48, %v2920_v1 }
 0x35e   :  { %v2189_v56 = vadd.f32 %v820_v54, %v2913_v42  ;;  %v2197_v0 = vadd.f32 %v891_v55, %v2917_v58  ;;  %v1292_v54 = vld [vmem:[#allocation15 + $0x20] sm:$0xff]  ;;  %v1293_v55 = vld [vmem:[#allocation15 + $0x28] sm:$0xff] }
 0x35f   :  { %v1676_v57 = vmul.f32 -1.442695, %v2188_v49 }
 0x360   :  { %v1677_v59 = vmul.f32 -1.442695, %v2189_v56  ;;  %v1678_v6 = vmul.f32 -1.442695, %v2197_v0  ;;  %v1396_v56 = vld [vmem:[#allocation7] sm:$0xff] }
 0x361   :  { %2249 = vpow2.f32 %v1676_v57  ;;  %v2124_v57 = vpack.c.bf16 %v1293_v55, %v1292_v54  ;;  %v1294_v0 = vld [vmem:[#allocation15 + $0x30] sm:$0xff] }
 0x362   :  { %2251 = vpow2.f32 %v1677_v59  ;;  %v1397_v59 = vld [vmem:[#allocation7 + $0x8] sm:$0xff] }
 0x363   :  { %2253 = vpow2.f32 %v1678_v6  ;;  %v1295_v6 = vld [vmem:[#allocation15 + $0x38] sm:$0xff] }
 0x364   :  { %2255 = vtanh.f32 %v2196_v7  ;;  %v2128_v7 = vpack.c.bf16 %v1295_v6, %v1294_v0  ;;  %v1686_v0 = vld [vmem:[%s3147_s12] ss:$0 sm:$0xff] }
 0x36b   :  { %v2250_v34 = vpop.eup %2249 }
 0x36c   :  { %v2252_v10 = vpop.eup %2251  ;;  %v901_v36 = vadd.f32 1.0, %v2250_v34  ;;  %v1296_v34 = vld [vmem:[#allocation15 + $0x40] sm:$0xff] }
 0x36d   :  { %v907_v11 = vadd.f32 1.0, %v2252_v10  ;;  %v2254_v12 = vpop.eup %2253  ;;  %v1297_v10 = vld [vmem:[#allocation15 + $0x48] sm:$0xff] }
 0x36e   :  { %2257 = vrcp.f32 %v901_v36  ;;  %v2256_v13 = vpop.eup %2255  ;;  %v914_v25 = vadd.f32 1.0, %v2254_v12  ;;  %v1298_v36 = vld [vmem:[#allocation15 + $0x50] sm:$0xff] }
 0x36f   :  { %2259 = vrcp.f32 %v907_v11  ;;  %v1299_v11 = vld [vmem:[#allocation15 + $0x58] sm:$0xff] }
 0x370   :  { %2261 = vrcp.f32 %v914_v25  ;;  %v2136_v12 = vpack.c.bf16 %v1299_v11, %v1298_v36  ;;  %v1303_v25 = vld [vmem:[#allocation15 + $0x78] sm:$0xff] }
 0x378   :  { %v2258_v16 = vpop.eup %2257 }
 0x379   :  { %v2260_v21 = vpop.eup %2259  ;;  %v918_v24 = vmul.f32 %v2258_v16, %v2256_v13  ;;  %v1300_v13 = vld [vmem:[#allocation15 + $0x60] sm:$0xff]  ;;  %v1301_v16 = vld [vmem:[#allocation15 + $0x68] sm:$0xff] }
 0x37a   :  { %v917_v28 = vmul.f32 %v2260_v21, %v2923_v35  ;;  %v2262_v30 = vpop.eup %2261  ;;  %v1291_v35 = vld [vmem:[#allocation15 + $0x18] sm:$0xff]  ;;  %v2140_v21 = vpack.c.bf16 %v1301_v16, %v1300_v13 }
 0x37c   :  { %v2969_v29 = vadd.f32 %v918_v24, %v917_v28  ;;  %v1302_v24 = vld [vmem:[#allocation15 + $0x70] sm:$0xff] }
 0x37d   :  { %v2144_v28 = vpack.c.bf16 %v1303_v25, %v1302_v24 }
 0x37e   :  { %2263 = vtanh.f32 %v2969_v29 }
 0x388   :  { %v2264_v33 = vpop.eup %2263 }
 0x389   :  { %v2972_v40 = vmul.f32 %v2264_v33, %v2262_v30  ;;  %v1516_v30 = vld [vmem:[%s3148_s13 + $0x8] sm:$0xff] }
 0x38b   :  { %996 = vmatmul.mubr.f32.vlgmr.msra.gmra.mrb[8].mxu1 %v2972_v40  ;;  %1067 = vmatmul.mubr.f32.vlgmr.msra.gmra.mrb[4].mxu0 %v2972_v40 }
 0x38c   :  { %2055 = vmatpush1.bf16.msra.mxu1 %v2769_v50  ;;  %2087 = vmatpush1.bf16.msra.mxu0 %v2771_v51  ;;  %v1289_v50 = vld [vmem:[#allocation15 + $0x8] sm:$0xff] }
 0x38d   :  { %2057 = vmatprep.subr.bf16.mxu1 %v2773_v60  ;;  %2089 = vmatprep.subr.bf16.mxu0 %v2775_v61  ;;  %v1400_v60 = vld [vmem:[%s3146_s11] sm:$0xff]  ;;  %v1401_v61 = vld [vmem:[%s3146_s11 + $0x8] sm:$0xf] }
 0x38e   :  { %1174 = vmatprep.mubr.f32.mxu1 %v2518_v37  ;;  %1245 = vmatprep.mubr.f32.mxu0 %v2518_v37  ;;  %v1288_v37 = vld [vmem:[#allocation15] sm:$0xff] }
 0x38f   :  { %v2116_v51 = vpack.c.bf16 %v1289_v50, %v1288_v37  ;;  %v1517_v37 = vld [vmem:[%s3148_s13 + $0x10] sm:$0xff] }
 0x390   :  { %2059 = vmatpush1.bf16.msra.mxu1 %v2781_v3  ;;  %2091 = vmatpush1.bf16.msra.mxu0 %v2783_v4  ;;  %v2148_v3 = vpack.c.bf16 %v1401_v61, %v1400_v60  ;;  %v1520_v60 = vld [vmem:[%s3148_s13 + $0x28] sm:$0xff]  ;;  %v1522_v4 = vld [vmem:[%s3148_s13 + $0x38] sm:$0xff] }
 0x391   :  { %2061 = vmatprep.subr.bf16.mxu1 %v2787_v8  ;;  %2093 = vmatprep.subr.bf16.mxu0 %v2789_v9 }
 0x394   :  { %2063 = vmatpush1.bf16.msra.mxu1 %v2797_v18  ;;  %2095 = vmatpush1.bf16.msra.mxu0 %v2799_v19 }
 0x395   :  { %2065 = vmatprep.subr.bf16.mxu1 %v2803_v22  ;;  %2097 = vmatprep.subr.bf16.mxu0 %v2805_v23 }
 0x398   :  { %2067 = vmatpush1.bf16.msra.mxu1 %v2813_v31  ;;  %2099 = vmatpush1.bf16.msra.mxu0 %v2815_v32 }
 0x399   :  { %2069 = vmatprep.subr.bf16.mxu1 %v2819_v38  ;;  %2101 = vmatprep.subr.bf16.mxu0 %v2821_v39 }
 0x39c   :  { %2071 = vmatpush1.bf16.msra.mxu1 %v2829_v46  ;;  %2103 = vmatpush1.bf16.msra.mxu0 %v2831_v47 }
 0x39d   :  { %2073 = vmatprep.subr.bf16.mxu1 %v2835_v52  ;;  %2105 = vmatprep.subr.bf16.mxu0 %v2837_v53 }
 0x3a0   :  { %2075 = vmatpush1.bf16.msra.mxu1 %v2843_v62  ;;  %2107 = vmatpush1.bf16.msra.mxu0 %v2845_v63 }
 0x3a1   :  { %2077 = vmatprep.subr.bf16.mxu1 %v2849_v2  ;;  %2109 = vmatprep.subr.bf16.mxu0 %v2851_v5 }
 0x3a4   :  { %2079 = vmatpush1.bf16.msra.mxu1 %v2855_v14  ;;  %2111 = vmatpush1.bf16.msra.mxu0 %v2857_v15 }
 0x3a5   :  { %2081 = vmatprep.subr.bf16.mxu1 %v2861_v17  ;;  %2113 = vmatprep.subr.bf16.mxu0 %v2863_v20 }
 0x3a8   :  { %2083 = vmatpush1.bf16.msra.mxu1 %v2867_v26  ;;  %2115 = vmatpush1.bf16.msra.mxu0 %v2869_v27  ;;  %v1290_v27 = vld [vmem:[#allocation15 + $0x10] sm:$0xff] }
 0x3a9   :  { %2117 = vmatprep.subr.bf16.mxu1 %v2116_v51  ;;  %2150 = vmatprep.subr.msk.bf16.mxu0 %vm3014_vm4, %v2148_v3  ;;  %v2120_v49 = vpack.c.bf16 %v1291_v35, %v1290_v27 }
 0x45e   :  { %v997_v8 = vpop.f32.mrb[8].mxu1  ;;  %v1068_v9 = vpop.f32.mrb[4].mxu0 }
 0x45f   :  { %v2190_v18 = vadd.f32 %v997_v8, %v2911_v41  ;;  %v999_v19 = vpop.f32.mrb[9].mxu1  ;;  %v1070_v22 = vpop.f32.mrb[5].mxu0  ;;  %v2198_v46 = vadd.f32 %v1068_v9, %v2920_v1  ;;  %v1523_v9 = vld [vmem:[%s3148_s13 + $0x40] sm:$0xff] }
 0x460   :  { %v2191_v23 = vadd.f32 %v999_v19, %v2913_v42  ;;  %v2199_v38 = vadd.f32 %v1070_v22, %v2917_v58  ;;  %v1525_v22 = vld [vmem:[%s3148_s13 + $0x50] sm:$0xff] }
 0x461   :  { %v1679_v31 = vmul.f32 -1.442695, %v2190_v18  ;;  %v1524_v18 = vld [vmem:[%s3148_s13 + $0x48] sm:$0xff] }
 0x462   :  { %v1680_v32 = vmul.f32 -1.442695, %v2191_v23  ;;  %v1681_v39 = vmul.f32 -1.442695, %v2199_v38  ;;  %v2170_v19 = vpack.c.bf16 %v1524_v18, %v1523_v9  ;;  %v1526_v23 = vld [vmem:[%s3148_s13 + $0x58] sm:$0xff]  ;;  %v1528_v38 = vld [vmem:[%s3148_s13 + $0x68] sm:$0xff] }
 0x463   :  { %2265 = vpow2.f32 %v1679_v31  ;;  %v2174_v31 = vpack.c.bf16 %v1526_v23, %v1525_v22 }
 0x464   :  { %2267 = vpow2.f32 %v1680_v32  ;;  %v1527_v32 = vld [vmem:[%s3148_s13 + $0x60] sm:$0xff] }
 0x465   :  { %2269 = vpow2.f32 %v1681_v39  ;;  %v2178_v39 = vpack.c.bf16 %v1528_v38, %v1527_v32 }
 0x466   :  { %2271 = vtanh.f32 %v2198_v46  ;;  %v1529_v46 = vld [vmem:[%s3148_s13 + $0x70] sm:$0xff] }
 0x46d   :  { %v2266_v47 = vpop.eup %2265 }
 0x46e   :  { %v2268_v52 = vpop.eup %2267  ;;  %v1080_v53 = vadd.f32 1.0, %v2266_v47  ;;  %v1398_v47 = vld [vmem:[#allocation7 + $0x10] sm:$0xff] }
 0x46f   :  { %v1086_v62 = vadd.f32 1.0, %v2268_v52  ;;  %v2270_v63 = vpop.eup %2269  ;;  %v1530_v52 = vld [vmem:[%s3148_s13 + $0x78] sm:$0xff] }
 0x470   :  { %2273 = vrcp.f32 %v1080_v53  ;;  %v2272_v2 = vpop.eup %2271  ;;  %v1093_v17 = vadd.f32 1.0, %v2270_v63  ;;  %v1399_v53 = vld [vmem:[#allocation7 + $0x18] sm:$0xff] }
 0x471   :  { %2275 = vrcp.f32 %v1086_v62  ;;  %v2182_v62 = vpack.c.bf16 %v1530_v52, %v1529_v46 }
 0x472   :  { %2277 = vrcp.f32 %v1093_v17 }
 0x47a   :  { %v2274_v5 = vpop.eup %2273 }
 0x47b   :  { %v2276_v14 = vpop.eup %2275  ;;  %v1097_v15 = vmul.f32 %v2274_v5, %v2272_v2 }
 0x47c   :  { %v1096_v20 = vmul.f32 %v2276_v14, %v2969_v29  ;;  %v2278_v43 = vpop.eup %2277  ;;  %v1515_v29 = vld [vmem:[%s3148_s13] sm:$0xff] }
 0x47d   :  { %v2154_v33 = vpack.c.bf16 %v1516_v30, %v1515_v29 }
 0x47e   :  { %v3025_v26 = vadd.f32 %v1097_v15, %v1096_v20 }
 0x480   :  { %2279 = vtanh.f32 %v3025_v26 }
 0x48a   :  { %v2280_v45 = vpop.eup %2279 }
 0x48b   :  { %v1100_v48 = vmul.f32 %v2280_v45, %v2278_v43 }
 0x48d   :  { %1175 = vmatmul.mubr.f32.vlgmr.msra.gmra.mrb[10].mxu1 %v1100_v48  ;;  %1246 = vmatmul.mubr.f32.vlgmr.msra.gmra.mrb[6].mxu0 %v1100_v48 }
 0x48e   :  { %2119 = vmatpush3.bf16.msra.mxu1 %v2116_v51  ;;  %1786 = vmatprep.mubr.f32.mxu1 %v2926_v44  ;;  %v2132_v44 = vpack.c.bf16 %v1297_v10, %v1296_v34  ;;  %v1519_v51 = vld [vmem:[%s3148_s13 + $0x20] sm:$0xff] }
 0x48f   :  { %2121 = vmatprep.subr.bf16.mxu1 %v2120_v49  ;;  %2153 = vmatpush3.bf16.msk.msra.mxu0 %vm3014_vm4, %v2148_v3  ;;  %v2162_v61 = vpack.c.bf16 %v1520_v60, %v1519_v51  ;;  %v1521_v3 = vld [vmem:[%s3148_s13 + $0x30] sm:$0xff]  ;;  %v1685_v34 = vld [vmem:[%s3145_s10] ss:$0 sm:$0xff] }
 0x490   :  { %1796 = vmatprep.mubr.msk.f32.mxu0 %vm1409_vm5, %v1396_v56  ;;  %2155 = vmatprep.subr.bf16.mxu0 %v2154_v33  ;;  %v2166_v8 = vpack.c.bf16 %v1522_v4, %v1521_v3 }
 0x492   :  { %2123 = vmatpush3.bf16.msra.mxu1 %v2120_v49  ;;  %1797 = vmatmul.mubr.msk.f32.vlgmr.msra.gmra.mrb[8].mxu0 %vm1409_vm5, %v1397_v59 }
 0x493   :  { %2125 = vmatprep.subr.bf16.mxu1 %v2124_v57  ;;  %2157 = vmatpush3.bf16.msra.mxu0 %v2154_v33 }
 0x494   :  { %1799 = vmatprep.mubr.msk.f32.mxu0 %vm1409_vm5, %v1398_v47 }
 0x496   :  { %2127 = vmatpush3.bf16.msra.mxu1 %v2124_v57  ;;  %1800 = vmatmul.mubr.msk.f32.gmra.mrb[10].mxu0 %vm1409_vm5, %v1399_v53 }
 0x497   :  { %2129 = vmatprep.subr.bf16.mxu1 %v2128_v7 }
 0x49a   :  { %2131 = vmatpush3.bf16.msra.mxu1 %v2128_v7 }
 0x49b   :  { %2133 = vmatprep.subr.bf16.mxu1 %v2132_v44 }
 0x49e   :  { %2135 = vmatpush3.bf16.msra.mxu1 %v2132_v44 }
 0x49f   :  { %2137 = vmatprep.subr.bf16.mxu1 %v2136_v12 }
 0x4a2   :  { %2139 = vmatpush3.bf16.msra.mxu1 %v2136_v12 }
 0x4a3   :  { %2141 = vmatprep.subr.bf16.mxu1 %v2140_v21 }
 0x4a6   :  { %2143 = vmatpush3.bf16.msra.mxu1 %v2140_v21 }
 0x4a7   :  { %2145 = vmatprep.subr.bf16.mxu1 %v2144_v28 }
 0x4aa   :  { %2147 = vmatpush3.bf16.msra.mxu1 %v2144_v28 }
 0x4ad   :  { %1787 = vmatmul.mubr.f32.vlgmr.msra.gmra.mrb[12].mxu1 %v2972_v40  ;;  %v1518_v40 = vld [vmem:[%s3148_s13 + $0x18] sm:$0xff] }
 0x4ae   :  { %1789 = vmatprep.mubr.f32.mxu1 %v1100_v48  ;;  %v2158_v50 = vpack.c.bf16 %v1518_v40, %v1517_v37 }
 0x4b0   :  { %2159 = vmatprep.subr.bf16.mxu0 %v2158_v50 }
 0x4b1   :  { %2161 = vmatpush3.bf16.msra.mxu0 %v2158_v50 }
 0x4b2   :  { %2163 = vmatprep.subr.bf16.mxu0 %v2162_v61 }
 0x4b5   :  { %2165 = vmatpush3.bf16.msra.mxu0 %v2162_v61 }
 0x4b6   :  { %2167 = vmatprep.subr.bf16.mxu0 %v2166_v8 }
 0x4b9   :  { %2169 = vmatpush3.bf16.msra.mxu0 %v2166_v8 }
 0x4ba   :  { %2171 = vmatprep.subr.bf16.mxu0 %v2170_v19 }
 0x4bd   :  { %2173 = vmatpush3.bf16.msra.mxu0 %v2170_v19 }
 0x4be   :  { %2175 = vmatprep.subr.bf16.mxu0 %v2174_v31 }
 0x4c1   :  { %2177 = vmatpush3.bf16.msra.mxu0 %v2174_v31 }
 0x4c2   :  { %2179 = vmatprep.subr.bf16.mxu0 %v2178_v39 }
 0x4c5   :  { %2181 = vmatpush3.bf16.msra.mxu0 %v2178_v39 }
 0x4c6   :  { %2183 = vmatprep.subr.bf16.mxu0 %v2182_v62 }
 0x4c9   :  { %2185 = vmatpush3.bf16.msra.mxu0 %v2182_v62 }
 0x560   :  { %v1176_v63 = vpop.f32.mrb[10].mxu1  ;;  %v1247_v2 = vpop.f32.mrb[6].mxu0 }
 0x561   :  { %v2192_v5 = vadd.f32 %v1176_v63, %v2911_v41  ;;  %v1178_v14 = vpop.f32.mrb[11].mxu1  ;;  %v1249_v15 = vpop.f32.mrb[7].mxu0  ;;  %v2200_v49 = vadd.f32 %v1247_v2, %v2920_v1 }
 0x562   :  { %v2193_v17 = vadd.f32 %v1178_v14, %v2913_v42  ;;  %v2201_v45 = vadd.f32 %v1249_v15, %v2917_v58 }
 0x563   :  { %v1682_v20 = vmul.f32 -1.442695, %v2192_v5 }
 0x564   :  { %v1683_v27 = vmul.f32 -1.442695, %v2193_v17  ;;  %v1684_v48 = vmul.f32 -1.442695, %v2201_v45 }
 0x565   :  { %2281 = vpow2.f32 %v1682_v20  ;;  %v1798_v35 = vpop.f32.mrb[8].mxu0 }
 0x566   :  { %2283 = vpow2.f32 %v1683_v27  ;;  %v1492_v43 = vpop.f32.mrb[9].mxu0  ;;  %v1498_v10 = vadd.f32 %v1798_v35, %v1686_v0 }
 0x567   :  { %2285 = vpow2.f32 %v1684_v48  ;;  %v1493_v36 = vadd.f32 %v1686_v0, %v1492_v43 }
 0x568   :  { %2287 = vtanh.f32 %v2200_v49 }
 0x569   :  { %v1801_v29 = vpop.f32.mrb[10].mxu0 }
 0x56a   :  { %v1502_v30 = vpop.f32.mrb[11].mxu0  ;;  %v1508_v40 = vadd.f32 %v1801_v29, %v1686_v0 }
 0x56b   :  { %v1503_v50 = vadd.f32 %v1686_v0, %v1502_v30 }
 0x56f   :  { %v2282_v54 = vpop.eup %2281 }
 0x570   :  { %v2284_v55 = vpop.eup %2283  ;;  %v1259_v56 = vadd.f32 1.0, %v2282_v54 }
 0x571   :  { %v1265_v41 = vadd.f32 1.0, %v2284_v55  ;;  %v2286_v42 = vpop.eup %2285 }
 0x572   :  { %2289 = vrcp.f32 %v1259_v56  ;;  %v2288_v57 = vpop.eup %2287  ;;  %v1272_v7 = vadd.f32 1.0, %v2286_v42 }
 0x573   :  { %2291 = vrcp.f32 %v1265_v41 }
 0x574   :  { %2293 = vrcp.f32 %v1272_v7 }
 0x57c   :  { %v2290_v59 = vpop.eup %2289 }
 0x57d   :  { %v2292_v6 = vpop.eup %2291  ;;  %v1276_v58 = vmul.f32 %v2290_v59, %v2288_v57 }
 0x57e   :  { %v1275_v1 = vmul.f32 %v2292_v6, %v3025_v26  ;;  %v2294_v25 = vpop.eup %2293 }
 0x580   :  { %v1788_v44 = vpop.f32.mrb[12].mxu1  ;;  %v1277_v11 = vadd.f32 %v1276_v58, %v1275_v1 }
 0x581   :  { %v1383_v12 = vadd.f32 %v1788_v44, %v1685_v34  ;;  %v1377_v13 = vpop.f32.mrb[13].mxu1 }
 0x582   :  { %v1378_v16 = vadd.f32 %v1685_v34, %v1377_v13  ;;  %2295 = vtanh.f32 %v1277_v11  ;;  %1283 = vst [vmem:[#allocation17] sm:$0xff] %v1277_v11 }
 0x583   :  { %v1512_v21 = vmul.f32 %v1498_v10, %v1383_v12 }
 0x584   :  { %v1511_v24 = vmul.f32 %v1493_v36, %v1378_v16 }
 0x586   :  { %1834 = vmatprep.mubr.f32.mxu0 %v1511_v24 }
 0x587   :  { %1835 = vmatmul.mubr.f32.vlgmr.msra.gmra.mrb[12].mxu0 %v1512_v21 }
 0x58c   :  { %v2296_v26 = vpop.eup %2295 }
 0x58d   :  { %v1279_v28 = vmul.f32 %v2296_v26, %v2294_v25 }
 0x58f   :  { %1790 = vmatmul.mubr.f32.gmra.mrb[14].mxu1 %v1279_v28  ;;  %1282 = vst [vmem:[#allocation16] sm:$0xff] %v1279_v28 }
 0x65a   :  { %v1836_v33 = vpop.f32.mrb[12].mxu0 }
 0x65b   :  { %1618 = vst.msk [vmem:[%s3149_s14 + $0x8] sm:$0xff] %vm1616_vm6, %v1836_v33  ;;  %v1597_v37 = vpop.f32.mrb[13].mxu0 }
 0x65c   :  { %1617 = vst.msk [vmem:[%s3149_s14] sm:$0xff] %vm1616_vm6, %v1597_v37 }
 0x662   :  { %v1791_v51 = vpop.f32.mrb[14].mxu1 }
 0x663   :  { %v1393_v60 = vadd.f32 %v1791_v51, %v1685_v34  ;;  %v1387_v61 = vpop.f32.mrb[15].mxu1 }
 0x664   :  { %v1388_v3 = vadd.f32 %v1685_v34, %v1387_v61 }
 0x665   :  { %v1514_v4 = vmul.f32 %v1508_v40, %v1393_v60 }
 0x666   :  { %v1513_v8 = vmul.f32 %v1503_v50, %v1388_v3 }
 0x668   :  { %1837 = vmatprep.mubr.f32.mxu0 %v1513_v8 }
 0x669   :  { %1838 = vmatmul.mubr.f32.gmra.mrb[14].mxu0 %v1514_v4 }
 0x66a   :  { %2462 = shalt.err (!%p2459_p4)
}
 0x66b   :  { %s2463_s6 = scalar_lea.hbm %s3150_s15, 128 }
 0x66c   :  { %p2464_p5 = scmp.ne.s32.totalorder %s3150_s15, %s2463_s6  ;;  %p2467_p6 = scmp.lt.u32.totalorder %s2463_s6, %s3150_s15 }
 0x66e   :  { %p2469_p7 = pnand %p2467_p6, %p2464_p5 }
 0x670   :  { %2472 = shalt.err (!%p2469_p7)
}
 0x671   :  { %1632 = dma.vmem_to_hbm [thread:$0]  %s1630_s2, 128, %s3150_s15, [#allocation6]  }
 0x672   :  { %s2473_s1 = scalar_lea.vmem %s1640_s26, 128  ;;  %p2478_p9 = scmp.lt.s32.totalorder %s1640_s26, %s1640_s26 }
 0x673   :  { %p2474_p8 = scmp.ne.s32.totalorder %s1640_s26, %s2473_s1  ;;  %p2479_p10 = scmp.lt.s32.totalorder %s2473_s1, %s2473_s1 }
 0x675   :  { %p2480_p11 = por %p2479_p10, %p2478_p9 }
 0x677   :  { %p2481_p12 = pnand %p2480_p11, %p2474_p8 }
 0x679   :  { %2484 = shalt.err (!%p2481_p12)
}
 0x67a   :  { %s2485_s30 = scalar_lea.hbm %s3151_s16, 128 }
 0x67b   :  { %p2486_p13 = scmp.ne.s32.totalorder %s3151_s16, %s2485_s30  ;;  %p2489_p0 = scmp.lt.u32.totalorder %s2485_s30, %s3151_s16 }
 0x67d   :  { %p2491_p1 = pnand %p2489_p0, %p2486_p13 }
 0x67f   :  { %2494 = shalt.err (!%p2491_p1)
}
 0x680   :  { %1642 = dma.vmem_to_hbm [thread:$0]  %s1640_s26, 128, %s3151_s16, [#allocation18]  }
 0x73c   :  { %v1839_v9 = vpop.f32.mrb[14].mxu0 }
 0x73d   :  { %1620 = vst.msk [vmem:[%s3149_s14 + $0x18] sm:$0xff] %vm1616_vm6, %v1839_v9  ;;  %v1607_v18 = vpop.f32.mrb[15].mxu0 }
 0x73e   :  { %1619 = vst.msk [vmem:[%s3149_s14 + $0x10] sm:$0xff] %vm1616_vm6, %v1607_v18 }
 0x73f   :  { %2503 = dma.done.wait [#allocation6], 128  }
 0x740   :  { %2504 = vsyncadd [#allocation6], 4294967168 }
 0x741   :  { %2505 = dma.done.wait [#allocation18], 128  }
 0x742   :  { %2506 = vsyncadd [#allocation18], 4294967168 }
 0x743   :  { %1651 = vsyncpa [#allocation5], 1 }
 0x744   :  { %1652 = vsyncpa [#allocation8], 1 }
 0x745   :  { %1653 = vsyncpa [#allocation11], 1 }
 0x746   :  { %1654 = vsyncpa [#allocation14], 1 }
 0x747   :  { %1655 = vsyncpa [#allocation6], 1 }
 0x748   :  { %1656 = vsyncpa [#allocation18], 1 }

</bundles_post_ra>
